<compile_context>
chip_gen: v7x
topology: tpu7x:2x2x1
jax: 0.10.0
libtpu: 0.0.40
codegen_flags: <defaults>
</compile_context>

<pallas_src>
import functools
import math

import jax
import jax.numpy as jnp
from jax.experimental import pallas as pl
from jax.experimental.pallas import tpu as pltpu

_VMEM = pl.BlockSpec(memory_space=pltpu.MemorySpace.VMEM)

_NUM_ANCHORS = 15                           # 5 sizes x 3 ratios
_HEAD_LANES = 128                           # lane-dense combined head / output width
_DELTA_COLS = 4 * _NUM_ANCHORS              # 60: decoded proposals live in cols [0, 60)
_SCORE_COL0 = 64                            # object scores live in cols [64, 79)
_BBOX_XFORM_CLIP = math.log(1000.0 / 16.0)  # standard dw/dh clamp before exp


# ----------------------------------------------------------------------------
# Fused Pallas kernel: backbone conv + rpn.conv + heads + box decode/clamp
# ----------------------------------------------------------------------------
def _rpn_fused_kernel(H, W, C,
                      x_ref, wbb_ref, bbb_ref, wcv_ref, bcv_ref, whd_ref, bhd_ref,
                      mask_ref, size_c_ref, ctr_ref, size_wh_ref, clamp_ref, rest_ref,
                      out_ref):
    HW = H * W

    # -- backbone: 3x3 conv as one K=9*Cin bf16 matmul (+bias, ReLU) -----------------
    feat = jnp.dot(x_ref[...], wbb_ref[...], preferred_element_type=jnp.float32)
    feat = jnp.maximum(feat + bbb_ref[...], 0.0)                        # (HW, C) f32

    # -- rpn.conv: 9 shift-and-accumulate matmuls (roll on XLU, mask on VPU) ----------
    # Tap (dy, dx) samples neighbour (h+dy-1, w+dx-1); in the row-major (HW, C) layout
    # that is row p + off with off = (dy-1)*W + (dx-1).  pltpu.roll by (-off) mod HW
    # brings that row to position p; the precomputed per-tap mask zeroes rows whose
    # neighbour falls outside the image (== the conv's zero padding).
    acc = jnp.zeros((HW, C), jnp.float32)
    for dy in range(3):
        for dx in range(3):
            tap = dy * 3 + dx
            off = (dy - 1) * W + (dx - 1)
            w_tap = wcv_ref[tap * C:(tap + 1) * C, :]                   # (C, C) bf16
            if off == 0:
                src = feat
            else:
                src = pltpu.roll(feat, (-off) % HW, axis=0)             # src[p] = feat[p+off]
                src = src * mask_ref[:, tap:tap + 1]                    # zero out-of-image taps
            acc = acc + jnp.dot(src.astype(jnp.bfloat16), w_tap,
                                preferred_element_type=jnp.float32)
    hidden = jnp.maximum(acc + bcv_ref[...], 0.0)                       # (HW, C) f32

    # -- heads: object scores + anchor deltas in one lane-dense matmul ----------------
    heads = jnp.dot(hidden.astype(jnp.bfloat16), whd_ref[...],
                    preferred_element_type=jnp.float32) + bhd_ref[...]  # (HW, 128)

    # -- fused box decode (apply_delta_to_proposals) + clamp, no MXU ------------------
    # center lanes 4a+{0,1}: c    = dx*aw + acx / dy*ah + acy   (size_c/ctr zero elsewhere)
    # wh     lanes 4a+{2,3}: half = 0.5*exp(min(dw,CLIP))*aw / 0.5*exp(min(dh,CLIP))*ah
    # box[4a+{0..3}] = [cx-hw, cy-hh, cx+hw, cy+hh]; the four terms below have disjoint
    # lane support, so the combine is two lane rolls + adds (no selects, no decode matmul).
    c = heads * size_c_ref[...] + ctr_ref[...]
    half = jnp.exp(jnp.minimum(heads, _BBOX_XFORM_CLIP)) * size_wh_ref[...]
    box = (c + half
           + pltpu.roll(c, 2, axis=1)                       # c from lane-2  -> x2/y2 lanes
           - pltpu.roll(half, _HEAD_LANES - 2, axis=1))     # half from lane+2 -> x1/y1 lanes
    box = jnp.clip(box, 0.0, clamp_ref[...])
    # decoded proposals in the delta lanes (box == 0 outside them), raw scores elsewhere.
    out_ref[...] = box + heads * rest_ref[...]


def rpn_fused_forward(x_patches, params, H, W, C):
    """x_patches: (H*W, 9*Cin) bf16 im2col of the padded input -> (H*W, 128) packed output."""
    kernel = functools.partial(_rpn_fused_kernel, H, W, C)
    # Grid-less single block: optimal at this toy 8x8 size.  At production feature sizes
    # add a row-tiled grid (dimension_semantics=("parallel",...)) sized against the
    # per-chip VMEM budget (v7x: 64 MiB / 2 TCs; v6e/v5e: 128 MiB / 1 TC).
    return pl.pallas_call(
        kernel,
        out_shape=jax.ShapeDtypeStruct((H * W, _HEAD_LANES), jnp.float32),
        in_specs=[_VMEM] * 13,
        out_specs=_VMEM,
    )(x_patches, *params)


# ----------------------------------------------------------------------------
# Plain-JAX glue (parameter setup, anchors, post-processing)
# ----------------------------------------------------------------------------
def _make_anchors(H, W, stride, sizes, ratios):
    """(H, W, num_anchors, 4) -> (H*W*num_anchors, 4), x1y1x2y2, ordering (h, w, a)."""
    ws, hs = [], []
    for s in sizes:
        for r in ratios:
            ws.append(s * (r ** 0.5))
            hs.append(s / (r ** 0.5))
    ws = jnp.asarray(ws, jnp.float32)
    hs = jnp.asarray(hs, jnp.float32)
    cy = (jnp.arange(H, dtype=jnp.float32) + 0.5) * stride
    cx = (jnp.arange(W, dtype=jnp.float32) + 0.5) * stride
    cy, cx = jnp.meshgrid(cy, cx, indexing="ij")
    cx = cx[:, :, None]
    cy = cy[:, :, None]
    x1 = cx - 0.5 * ws
    y1 = cy - 0.5 * hs
    x2 = cx + 0.5 * ws
    y2 = cy + 0.5 * hs
    return jnp.stack([x1, y1, x2, y2], axis=-1).reshape(-1, 4)


def _init_param(key, shape, scale=0.02):
    return scale * jax.random.normal(key, shape, jnp.float32)


class LearningRegionProposalNetworkPallas:
    """Pallas port of Learning_Region_Proposal_Network (inference path, is_train=False)."""

    def __init__(self, key, img_channels=4, feat_channels=128, H=8, W=8,
                 num_sizes=5, num_ratios=3, image_shape=(64, 64)):
        self.H, self.W = H, W
        self.C = feat_channels
        self.num_anchors = num_sizes * num_ratios            # 5 * 3 = 15
        self.image_shape = image_shape
        self.is_train = False
        # TODO(synk): training losses (box matching / label subsampling / smooth-L1 / BCE)
        #             are only reachable with is_train=True and GTs; not implemented.

        HW = H * W
        k = iter(jax.random.split(key, 8))
        # backbone: 3x3 conv img_channels -> feat_channels (+ReLU), bf16 tap-major weights.
        self.w_bb = _init_param(next(k), (9 * img_channels, feat_channels)).astype(jnp.bfloat16)
        self.b_bb = jnp.zeros((1, feat_channels), jnp.float32)
        # rpn.conv: 3x3 conv feat -> feat (+ReLU), bf16 tap-major weights (rows tap*C..).
        self.w_conv = _init_param(next(k), (9 * feat_channels, feat_channels)).astype(jnp.bfloat16)
        self.b_conv = jnp.zeros((1, feat_channels), jnp.float32)
        # rpn heads packed into one lane-dense (C, 128) weight:
        #   cols [0, 60): anchor_deltas (anchor-major a*4+comp), cols [64, 79): object_scores.
        w_delta = _init_param(next(k), (feat_channels, self.num_anchors * 4))
        w_score = _init_param(next(k), (feat_channels, self.num_anchors))
        w_heads = jnp.zeros((feat_channels, _HEAD_LANES), jnp.float32)
        w_heads = w_heads.at[:, :_DELTA_COLS].set(w_delta)
        w_heads = w_heads.at[:, _SCORE_COL0:_SCORE_COL0 + self.num_anchors].set(w_score)
        self.w_heads = w_heads.astype(jnp.bfloat16)
        self.b_heads = jnp.zeros((1, _HEAD_LANES), jnp.float32)

        # TinyAnchor stand-in
        stride = image_shape[1] / W
        sizes = [stride * (i + 1) for i in range(num_sizes)]
        ratios = [0.5, 1.0, 2.0]
        self.anchors = _make_anchors(H, W, stride, sizes, ratios)        # (H*W*15, 4)

        # --- per-tap boundary masks for the roll-based 3x3 conv (1 = in-image neighbour)
        pos = jnp.arange(HW)
        hh = pos // W
        ww = pos % W
        cols = []
        for dy in range(3):
            for dx in range(3):
                vh = jnp.ones_like(hh, dtype=bool) if dy == 1 else (hh >= 1 if dy == 0 else hh <= H - 2)
                vw = jnp.ones_like(ww, dtype=bool) if dx == 1 else (ww >= 1 if dx == 0 else ww <= W - 2)
                cols.append((vh & vw).astype(jnp.float32))
        self.tap_mask = jnp.stack(cols, axis=1)                           # (HW, 9)

        # --- precomputed decode constants in the anchor-major (HW, 60) layout, padded to 128
        a = self.anchors.reshape(HW, self.num_anchors, 4)
        aw = a[:, :, 2] - a[:, :, 0]
        ah = a[:, :, 3] - a[:, :, 1]
        acx = a[:, :, 0] + 0.5 * aw
        acy = a[:, :, 1] + 0.5 * ah
        z = jnp.zeros_like(aw)

        def pad_lanes(m60):
            return jnp.zeros((HW, _HEAD_LANES), jnp.float32).at[:, :_DELTA_COLS].set(m60)

        self.size_c = pad_lanes(jnp.stack([aw, ah, z, z], axis=-1).reshape(HW, _DELTA_COLS))
        self.ctr = pad_lanes(jnp.stack([acx, acy, z, z], axis=-1).reshape(HW, _DELTA_COLS))
        self.size_wh_half = pad_lanes(jnp.stack([z, z, 0.5 * aw, 0.5 * ah],
                                                axis=-1).reshape(HW, _DELTA_COLS))
        img_h, img_w = float(image_shape[0]), float(image_shape[1])
        clamp60 = jnp.tile(jnp.asarray([img_w, img_h, img_w, img_h], jnp.float32),
                           self.num_anchors)
        self.clamp_max = jnp.full((1, _HEAD_LANES), 1e30,
                                  jnp.float32).at[0, :_DELTA_COLS].set(clamp60)
        # pass-through selector for the non-delta lanes (scores stay raw logits)
        self.sel_rest = jnp.where(jnp.arange(_HEAD_LANES) < _DELTA_COLS, 0.0,
                                  1.0).reshape(1, _HEAD_LANES).astype(jnp.float32)

    # --- rpn.find_top_rpn_proposals (static-shape version) ---------------------
    def _find_top_rpn_proposals(self, proposals, scores,
                                pre_nms_topk=12000, post_nms_topk=2000):
        n = scores.shape[0]
        k = min(pre_nms_topk, n)
        order = jnp.argsort(-scores)
        idx = order[:k]
        top_scores = scores[idx]
        top_proposals = proposals[idx]
        widths = top_proposals[:, 2] - top_proposals[:, 0]
        heights = top_proposals[:, 3] - top_proposals[:, 1]
        valid = (jnp.all(jnp.isfinite(top_proposals), axis=1)
                 & jnp.isfinite(top_scores) & (widths > 0) & (heights > 0))
        # Dynamic boolean-mask filtering produces variable-length tensors; instead we
        # down-weight invalid entries (score -> -inf) to keep shapes static.
        top_scores = jnp.where(valid, top_scores, -jnp.inf)
        # TODO(synk): NMS (sequential, data-dependent suppression) has no clean Pallas
        #             equivalent; proposals are returned in score order without NMS.
        k2 = min(post_nms_topk, k)
        return top_proposals[:k2], top_scores[:k2]

    # --- fused-kernel packed forward (proposals in cols [0,60), scores in [64,79)) ----
    def _packed_outputs(self, x_nchw):
        H, W, C = self.H, self.W, self.C
        # x: (1, Cimg, H, W) in PyTorch NCHW convention; batch must be 1 (as in TinyRPN).
        x_hwc = jnp.transpose(x_nchw[0], (1, 2, 0)).astype(jnp.float32)   # (H, W, Cimg)
        x_pad = jnp.pad(x_hwc, ((1, 1), (1, 1), (0, 0)))
        # im2col of the raw input: (H*W, 9*Cin), column = tap*Cin + cin (matches w_bb rows).
        # Pre-cast to bf16 here (review item 4).  At production sizes this im2col would be
        # moved inside the kernel with the same roll trick.
        patches = [x_pad[dy:dy + H, dx:dx + W, :]
                   for dy in range(3) for dx in range(3)]
        x_patches = jnp.concatenate(patches, axis=-1).reshape(H * W, -1).astype(jnp.bfloat16)
        return rpn_fused_forward(
            x_patches,
            (self.w_bb, self.b_bb, self.w_conv, self.b_conv,
             self.w_heads, self.b_heads,
             self.tap_mask, self.size_c, self.ctr, self.size_wh_half,
             self.clamp_max, self.sel_rest),
            H, W, C)

    # --- full forward -----------------------------------------------------------
    def __call__(self, x_nchw):
        out = self._packed_outputs(x_nchw)
        # predict_proposals: (H*W, 60) anchor-major -> (H*W*15, 4), row = pos*15 + a
        proposals = out[:, :_DELTA_COLS].reshape(-1, 4)
        # predict_scores: NCHW permute(0,2,3,1).reshape(-1) == NHWC flatten == pos*15 + a
        scores = out[:, _SCORE_COL0:_SCORE_COL0 + self.num_anchors].reshape(-1)
        return self._find_top_rpn_proposals(proposals, scores)


# ----------------------------------------------------------------------------
# Pure-JAX reference of the packed kernel output (pad/im2col conv + natural-form
# box decode), used as a correctness check for the roll-based kernel.
# ----------------------------------------------------------------------------
def _reference_packed(model, x_nchw):
    H, W, C = model.H, model.W, model.C
    HW = H * W
    bf = lambda t: t.astype(jnp.bfloat16).astype(jnp.float32)
    x_hwc = jnp.transpose(x_nchw[0], (1, 2, 0)).astype(jnp.float32)
    x_pad = jnp.pad(x_hwc, ((1, 1), (1, 1), (0, 0)))
    x_cols = bf(jnp.concatenate([x_pad[dy:dy + H, dx:dx + W, :]
                                 for dy in range(3) for dx in range(3)],
                                axis=-1).reshape(HW, -1))
    feat = jnp.maximum(x_cols @ model.w_bb.astype(jnp.float32) + model.b_bb, 0.0)
    f_pad = jnp.pad(feat.reshape(H, W, C), ((1, 1), (1, 1), (0, 0)))
    cols = bf(jnp.concatenate([f_pad[dy:dy + H, dx:dx + W, :]
                               for dy in range(3) for dx in range(3)],
                              axis=-1).reshape(HW, 9 * C))
    hidden = jnp.maximum(cols @ model.w_conv.astype(jnp.float32) + model.b_conv, 0.0)
    heads = bf(hidden) @ model.w_heads.astype(jnp.float32) + model.b_heads
    # natural-form decode
    deltas = heads[:, :_DELTA_COLS].reshape(HW, _NUM_ANCHORS, 4)
    a = model.anchors.reshape(HW, _NUM_ANCHORS, 4)
    aw = a[..., 2] - a[..., 0]
    ah = a[..., 3] - a[..., 1]
    acx = a[..., 0] + 0.5 * aw
    acy = a[..., 1] + 0.5 * ah
    dw = jnp.minimum(deltas[..., 2], _BBOX_XFORM_CLIP)
    dh = jnp.minimum(deltas[..., 3], _BBOX_XFORM_CLIP)
    pcx = deltas[..., 0] * aw + acx
    pcy = deltas[..., 1] * ah + acy
    pw = jnp.exp(dw) * aw
    ph = jnp.exp(dh) * ah
    img_h, img_w = float(model.image_shape[0]), float(model.image_shape[1])
    x1 = jnp.clip(pcx - 0.5 * pw, 0.0, img_w)
    y1 = jnp.clip(pcy - 0.5 * ph, 0.0, img_h)
    x2 = jnp.clip(pcx + 0.5 * pw, 0.0, img_w)
    y2 = jnp.clip(pcy + 0.5 * ph, 0.0, img_h)
    boxes = jnp.stack([x1, y1, x2, y2], axis=-1).reshape(HW, _DELTA_COLS)
    out = jnp.zeros((HW, _HEAD_LANES), jnp.float32)
    out = out.at[:, :_DELTA_COLS].set(boxes)
    out = out.at[:, _DELTA_COLS:].set(heads[:, _DELTA_COLS:])
    return out


# ----------------------------------------------------------------------------
if __name__ == "__main__":
    key = jax.random.PRNGKey(0)
    model = LearningRegionProposalNetworkPallas(key)

    x = jax.random.normal(jax.random.fold_in(key, 123), (1, 4, 8, 8), jnp.float32)

    # kernel vs pure-JAX reference (same bf16 weight rounding, f32 accumulation)
    packed = jax.jit(model._packed_outputs)(x)
    ref = _reference_packed(model, x)
    jax.block_until_ready((packed, ref))
    max_err = float(jnp.max(jnp.abs(packed - ref)))
    assert max_err < 5e-2, f"kernel/reference mismatch: max abs err = {max_err}"

    fwd = jax.jit(model.__call__)
    proposals, scores = fwd(x)
    jax.block_until_ready((proposals, scores))

    assert proposals.shape == (8 * 8 * 15, 4)
    assert scores.shape == (8 * 8 * 15,)
    print("KERNEL_OK")
</pallas_src>

<mosaic_0001>
module attributes {stable_mosaic.version = 11 : i64} {
  func.func @_rpn_fused_kernel(%arg0: memref<64x36xbf16, #tpu.memory_space<vmem>>, %arg1: memref<36x128xbf16, #tpu.memory_space<vmem>>, %arg2: memref<1x128xf32, #tpu.memory_space<vmem>>, %arg3: memref<1152x128xbf16, #tpu.memory_space<vmem>>, %arg4: memref<1x128xf32, #tpu.memory_space<vmem>>, %arg5: memref<128x128xbf16, #tpu.memory_space<vmem>>, %arg6: memref<1x128xf32, #tpu.memory_space<vmem>>, %arg7: memref<64x9xf32, #tpu.memory_space<vmem>>, %arg8: memref<64x128xf32, #tpu.memory_space<vmem>>, %arg9: memref<64x128xf32, #tpu.memory_space<vmem>>, %arg10: memref<64x128xf32, #tpu.memory_space<vmem>>, %arg11: memref<1x128xf32, #tpu.memory_space<vmem>>, %arg12: memref<1x128xf32, #tpu.memory_space<vmem>>, %arg13: memref<64x128xf32, #tpu.memory_space<vmem>>) attributes {dimension_semantics = [], scalar_prefetch = 0 : i64, scratch_operands = 0 : i64, tpu.core_type = #tpu.core_type<tc>} {
    %c0 = arith.constant 0 : index
    %c0_0 = arith.constant 0 : index
    %0 = vector.load %arg0[%c0, %c0_0] : memref<64x36xbf16, #tpu.memory_space<vmem>>, vector<64x36xbf16>
    %c0_1 = arith.constant 0 : index
    %c0_2 = arith.constant 0 : index
    %1 = vector.load %arg1[%c0_1, %c0_2] : memref<36x128xbf16, #tpu.memory_space<vmem>>, vector<36x128xbf16>
    %cst = arith.constant dense<0.000000e+00> : vector<64x128xf32>
    %2 = tpu.matmul %0, %1, %cst {dimension_numbers = #tpu.dot_dimension_numbers<[1], [0], [0], [1], [0, 0, 1, 1], [], []>} : vector<64x36xbf16>, vector<36x128xbf16>, vector<64x128xf32> -> vector<64x128xf32>
    %c0_3 = arith.constant 0 : index
    %c0_4 = arith.constant 0 : index
    %3 = vector.load %arg2[%c0_3, %c0_4] : memref<1x128xf32, #tpu.memory_space<vmem>>, vector<1x128xf32>
    %4 = vector.broadcast %3 : vector<1x128xf32> to vector<64x128xf32>
    %5 = arith.addf %2, %4 : vector<64x128xf32>
    %cst_5 = arith.constant 0.000000e+00 : f32
    %6 = vector.broadcast %cst_5 : f32 to vector<64x128xf32>
    %7 = arith.maximumf %5, %6 : vector<64x128xf32>
    %cst_6 = arith.constant 0.000000e+00 : f32
    %8 = vector.broadcast %cst_6 : f32 to vector<64x128xf32>
    %c0_7 = arith.constant 0 : index
    %c0_8 = arith.constant 0 : index
    %9 = vector.load %arg3[%c0_7, %c0_8] : memref<1152x128xbf16, #tpu.memory_space<vmem>>, vector<128x128xbf16>
    %c9_i32 = arith.constant 9 : i32
    %10 = tpu.dynamic_rotate %7 by %c9_i32 dim 0 : vector<64x128xf32>, i32 -> vector<64x128xf32>
    %c0_9 = arith.constant 0 : index
    %c0_10 = arith.constant 0 : index
    %11 = vector.load %arg7[%c0_9, %c0_10] : memref<64x9xf32, #tpu.memory_space<vmem>>, vector<64x1xf32>
    %12 = vector.broadcast %11 : vector<64x1xf32> to vector<64x128xf32>
    %13 = arith.mulf %10, %12 : vector<64x128xf32>
    %14 = arith.truncf %13 : vector<64x128xf32> to vector<64x128xbf16>
    %cst_11 = arith.constant dense<0.000000e+00> : vector<64x128xf32>
    %15 = tpu.matmul %14, %9, %cst_11 {dimension_numbers = #tpu.dot_dimension_numbers<[1], [0], [0], [1], [0, 0, 1, 1], [], []>} : vector<64x128xbf16>, vector<128x128xbf16>, vector<64x128xf32> -> vector<64x128xf32>
    %16 = arith.addf %8, %15 : vector<64x128xf32>
    %c128 = arith.constant 128 : index
    %c0_12 = arith.constant 0 : index
    %17 = vector.load %arg3[%c128, %c0_12] : memref<1152x128xbf16, #tpu.memory_space<vmem>>, vector<128x128xbf16>
    %c8_i32 = arith.constant 8 : i32
    %18 = tpu.dynamic_rotate %7 by %c8_i32 dim 0 : vector<64x128xf32>, i32 -> vector<64x128xf32>
    %c0_13 = arith.constant 0 : index
    %c1 = arith.constant 1 : index
    %19 = vector.load %arg7[%c0_13, %c1] : memref<64x9xf32, #tpu.memory_space<vmem>>, vector<64x1xf32>
    %20 = vector.broadcast %19 : vector<64x1xf32> to vector<64x128xf32>
    %21 = arith.mulf %18, %20 : vector<64x128xf32>
    %22 = arith.truncf %21 : vector<64x128xf32> to vector<64x128xbf16>
    %cst_14 = arith.constant dense<0.000000e+00> : vector<64x128xf32>
    %23 = tpu.matmul %22, %17, %cst_14 {dimension_numbers = #tpu.dot_dimension_numbers<[1], [0], [0], [1], [0, 0, 1, 1], [], []>} : vector<64x128xbf16>, vector<128x128xbf16>, vector<64x128xf32> -> vector<64x128xf32>
    %24 = arith.addf %16, %23 : vector<64x128xf32>
    %c256 = arith.constant 256 : index
    %c0_15 = arith.constant 0 : index
    %25 = vector.load %arg3[%c256, %c0_15] : memref<1152x128xbf16, #tpu.memory_space<vmem>>, vector<128x128xbf16>
    %c7_i32 = arith.constant 7 : i32
    %26 = tpu.dynamic_rotate %7 by %c7_i32 dim 0 : vector<64x128xf32>, i32 -> vector<64x128xf32>
    %c0_16 = arith.constant 0 : index
    %c2 = arith.constant 2 : index
    %27 = vector.load %arg7[%c0_16, %c2] : memref<64x9xf32, #tpu.memory_space<vmem>>, vector<64x1xf32>
    %28 = vector.broadcast %27 : vector<64x1xf32> to vector<64x128xf32>
    %29 = arith.mulf %26, %28 : vector<64x128xf32>
    %30 = arith.truncf %29 : vector<64x128xf32> to vector<64x128xbf16>
    %cst_17 = arith.constant dense<0.000000e+00> : vector<64x128xf32>
    %31 = tpu.matmul %30, %25, %cst_17 {dimension_numbers = #tpu.dot_dimension_numbers<[1], [0], [0], [1], [0, 0, 1, 1], [], []>} : vector<64x128xbf16>, vector<128x128xbf16>, vector<64x128xf32> -> vector<64x128xf32>
    %32 = arith.addf %24, %31 : vector<64x128xf32>
    %c384 = arith.constant 384 : index
    %c0_18 = arith.constant 0 : index
    %33 = vector.load %arg3[%c384, %c0_18] : memref<1152x128xbf16, #tpu.memory_space<vmem>>, vector<128x128xbf16>
    %c1_i32 = arith.constant 1 : i32
    %34 = tpu.dynamic_rotate %7 by %c1_i32 dim 0 : vector<64x128xf32>, i32 -> vector<64x128xf32>
    %c0_19 = arith.constant 0 : index
    %c3 = arith.constant 3 : index
    %35 = vector.load %arg7[%c0_19, %c3] : memref<64x9xf32, #tpu.memory_space<vmem>>, vector<64x1xf32>
    %36 = vector.broadcast %35 : vector<64x1xf32> to vector<64x128xf32>
    %37 = arith.mulf %34, %36 : vector<64x128xf32>
    %38 = arith.truncf %37 : vector<64x128xf32> to vector<64x128xbf16>
    %cst_20 = arith.constant dense<0.000000e+00> : vector<64x128xf32>
    %39 = tpu.matmul %38, %33, %cst_20 {dimension_numbers = #tpu.dot_dimension_numbers<[1], [0], [0], [1], [0, 0, 1, 1], [], []>} : vector<64x128xbf16>, vector<128x128xbf16>, vector<64x128xf32> -> vector<64x128xf32>
    %40 = arith.addf %32, %39 : vector<64x128xf32>
    %c512 = arith.constant 512 : index
    %c0_21 = arith.constant 0 : index
    %41 = vector.load %arg3[%c512, %c0_21] : memref<1152x128xbf16, #tpu.memory_space<vmem>>, vector<128x128xbf16>
    %42 = arith.truncf %7 : vector<64x128xf32> to vector<64x128xbf16>
    %cst_22 = arith.constant dense<0.000000e+00> : vector<64x128xf32>
    %43 = tpu.matmul %42, %41, %cst_22 {dimension_numbers = #tpu.dot_dimension_numbers<[1], [0], [0], [1], [0, 0, 1, 1], [], []>} : vector<64x128xbf16>, vector<128x128xbf16>, vector<64x128xf32> -> vector<64x128xf32>
    %44 = arith.addf %40, %43 : vector<64x128xf32>
    %c640 = arith.constant 640 : index
    %c0_23 = arith.constant 0 : index
    %45 = vector.load %arg3[%c640, %c0_23] : memref<1152x128xbf16, #tpu.memory_space<vmem>>, vector<128x128xbf16>
    %c63_i32 = arith.constant 63 : i32
    %46 = tpu.dynamic_rotate %7 by %c63_i32 dim 0 : vector<64x128xf32>, i32 -> vector<64x128xf32>
    %c0_24 = arith.constant 0 : index
    %c5 = arith.constant 5 : index
    %47 = vector.load %arg7[%c0_24, %c5] : memref<64x9xf32, #tpu.memory_space<vmem>>, vector<64x1xf32>
    %48 = vector.broadcast %47 : vector<64x1xf32> to vector<64x128xf32>
    %49 = arith.mulf %46, %48 : vector<64x128xf32>
    %50 = arith.truncf %49 : vector<64x128xf32> to vector<64x128xbf16>
    %cst_25 = arith.constant dense<0.000000e+00> : vector<64x128xf32>
    %51 = tpu.matmul %50, %45, %cst_25 {dimension_numbers = #tpu.dot_dimension_numbers<[1], [0], [0], [1], [0, 0, 1, 1], [], []>} : vector<64x128xbf16>, vector<128x128xbf16>, vector<64x128xf32> -> vector<64x128xf32>
    %52 = arith.addf %44, %51 : vector<64x128xf32>
    %c768 = arith.constant 768 : index
    %c0_26 = arith.constant 0 : index
    %53 = vector.load %arg3[%c768, %c0_26] : memref<1152x128xbf16, #tpu.memory_space<vmem>>, vector<128x128xbf16>
    %c57_i32 = arith.constant 57 : i32
    %54 = tpu.dynamic_rotate %7 by %c57_i32 dim 0 : vector<64x128xf32>, i32 -> vector<64x128xf32>
    %c0_27 = arith.constant 0 : index
    %c6 = arith.constant 6 : index
    %55 = vector.load %arg7[%c0_27, %c6] : memref<64x9xf32, #tpu.memory_space<vmem>>, vector<64x1xf32>
    %56 = vector.broadcast %55 : vector<64x1xf32> to vector<64x128xf32>
    %57 = arith.mulf %54, %56 : vector<64x128xf32>
    %58 = arith.truncf %57 : vector<64x128xf32> to vector<64x128xbf16>
    %cst_28 = arith.constant dense<0.000000e+00> : vector<64x128xf32>
    %59 = tpu.matmul %58, %53, %cst_28 {dimension_numbers = #tpu.dot_dimension_numbers<[1], [0], [0], [1], [0, 0, 1, 1], [], []>} : vector<64x128xbf16>, vector<128x128xbf16>, vector<64x128xf32> -> vector<64x128xf32>
    %60 = arith.addf %52, %59 : vector<64x128xf32>
    %c896 = arith.constant 896 : index
    %c0_29 = arith.constant 0 : index
    %61 = vector.load %arg3[%c896, %c0_29] : memref<1152x128xbf16, #tpu.memory_space<vmem>>, vector<128x128xbf16>
    %c56_i32 = arith.constant 56 : i32
    %62 = tpu.dynamic_rotate %7 by %c56_i32 dim 0 : vector<64x128xf32>, i32 -> vector<64x128xf32>
    %c0_30 = arith.constant 0 : index
    %c7 = arith.constant 7 : index
    %63 = vector.load %arg7[%c0_30, %c7] : memref<64x9xf32, #tpu.memory_space<vmem>>, vector<64x1xf32>
    %64 = vector.broadcast %63 : vector<64x1xf32> to vector<64x128xf32>
    %65 = arith.mulf %62, %64 : vector<64x128xf32>
    %66 = arith.truncf %65 : vector<64x128xf32> to vector<64x128xbf16>
    %cst_31 = arith.constant dense<0.000000e+00> : vector<64x128xf32>
    %67 = tpu.matmul %66, %61, %cst_31 {dimension_numbers = #tpu.dot_dimension_numbers<[1], [0], [0], [1], [0, 0, 1, 1], [], []>} : vector<64x128xbf16>, vector<128x128xbf16>, vector<64x128xf32> -> vector<64x128xf32>
    %68 = arith.addf %60, %67 : vector<64x128xf32>
    %c1024 = arith.constant 1024 : index
    %c0_32 = arith.constant 0 : index
    %69 = vector.load %arg3[%c1024, %c0_32] : memref<1152x128xbf16, #tpu.memory_space<vmem>>, vector<128x128xbf16>
    %c55_i32 = arith.constant 55 : i32
    %70 = tpu.dynamic_rotate %7 by %c55_i32 dim 0 : vector<64x128xf32>, i32 -> vector<64x128xf32>
    %c0_33 = arith.constant 0 : index
    %c8 = arith.constant 8 : index
    %71 = vector.load %arg7[%c0_33, %c8] : memref<64x9xf32, #tpu.memory_space<vmem>>, vector<64x1xf32>
    %72 = vector.broadcast %71 : vector<64x1xf32> to vector<64x128xf32>
    %73 = arith.mulf %70, %72 : vector<64x128xf32>
    %74 = arith.truncf %73 : vector<64x128xf32> to vector<64x128xbf16>
    %cst_34 = arith.constant dense<0.000000e+00> : vector<64x128xf32>
    %75 = tpu.matmul %74, %69, %cst_34 {dimension_numbers = #tpu.dot_dimension_numbers<[1], [0], [0], [1], [0, 0, 1, 1], [], []>} : vector<64x128xbf16>, vector<128x128xbf16>, vector<64x128xf32> -> vector<64x128xf32>
    %76 = arith.addf %68, %75 : vector<64x128xf32>
    %c0_35 = arith.constant 0 : index
    %c0_36 = arith.constant 0 : index
    %77 = vector.load %arg4[%c0_35, %c0_36] : memref<1x128xf32, #tpu.memory_space<vmem>>, vector<1x128xf32>
    %78 = vector.broadcast %77 : vector<1x128xf32> to vector<64x128xf32>
    %79 = arith.addf %76, %78 : vector<64x128xf32>
    %cst_37 = arith.constant 0.000000e+00 : f32
    %80 = vector.broadcast %cst_37 : f32 to vector<64x128xf32>
    %81 = arith.maximumf %79, %80 : vector<64x128xf32>
    %82 = arith.truncf %81 : vector<64x128xf32> to vector<64x128xbf16>
    %c0_38 = arith.constant 0 : index
    %c0_39 = arith.constant 0 : index
    %83 = vector.load %arg5[%c0_38, %c0_39] : memref<128x128xbf16, #tpu.memory_space<vmem>>, vector<128x128xbf16>
    %cst_40 = arith.constant dense<0.000000e+00> : vector<64x128xf32>
    %84 = tpu.matmul %82, %83, %cst_40 {dimension_numbers = #tpu.dot_dimension_numbers<[1], [0], [0], [1], [0, 0, 1, 1], [], []>} : vector<64x128xbf16>, vector<128x128xbf16>, vector<64x128xf32> -> vector<64x128xf32>
    %c0_41 = arith.constant 0 : index
    %c0_42 = arith.constant 0 : index
    %85 = vector.load %arg6[%c0_41, %c0_42] : memref<1x128xf32, #tpu.memory_space<vmem>>, vector<1x128xf32>
    %86 = vector.broadcast %85 : vector<1x128xf32> to vector<64x128xf32>
    %87 = arith.addf %84, %86 : vector<64x128xf32>
    %c0_43 = arith.constant 0 : index
    %c0_44 = arith.constant 0 : index
    %88 = vector.load %arg8[%c0_43, %c0_44] : memref<64x128xf32, #tpu.memory_space<vmem>>, vector<64x128xf32>
    %89 = arith.mulf %87, %88 : vector<64x128xf32>
    %c0_45 = arith.constant 0 : index
    %c0_46 = arith.constant 0 : index
    %90 = vector.load %arg9[%c0_45, %c0_46] : memref<64x128xf32, #tpu.memory_space<vmem>>, vector<64x128xf32>
    %91 = arith.addf %89, %90 : vector<64x128xf32>
    %cst_47 = arith.constant 4.13516665 : f32
    %92 = vector.broadcast %cst_47 : f32 to vector<64x128xf32>
    %93 = arith.minimumf %87, %92 : vector<64x128xf32>
    %94 = math.exp %93 : vector<64x128xf32>
    %c0_48 = arith.constant 0 : index
    %c0_49 = arith.constant 0 : index
    %95 = vector.load %arg10[%c0_48, %c0_49] : memref<64x128xf32, #tpu.memory_space<vmem>>, vector<64x128xf32>
    %96 = arith.mulf %94, %95 : vector<64x128xf32>
    %97 = arith.addf %91, %96 : vector<64x128xf32>
    %c2_i32 = arith.constant 2 : i32
    %98 = tpu.dynamic_rotate %91 by %c2_i32 dim 1 : vector<64x128xf32>, i32 -> vector<64x128xf32>
    %99 = arith.addf %97, %98 : vector<64x128xf32>
    %c126_i32 = arith.constant 126 : i32
    %100 = tpu.dynamic_rotate %96 by %c126_i32 dim 1 : vector<64x128xf32>, i32 -> vector<64x128xf32>
    %101 = arith.subf %99, %100 : vector<64x128xf32>
    %c0_50 = arith.constant 0 : index
    %c0_51 = arith.constant 0 : index
    %102 = vector.load %arg11[%c0_50, %c0_51] : memref<1x128xf32, #tpu.memory_space<vmem>>, vector<1x128xf32>
    %cst_52 = arith.constant 0.000000e+00 : f32
    %103 = vector.broadcast %cst_52 : f32 to vector<64x128xf32>
    %104 = arith.maximumf %103, %101 : vector<64x128xf32>
    %105 = vector.broadcast %102 : vector<1x128xf32> to vector<64x128xf32>
    %106 = arith.minimumf %105, %104 : vector<64x128xf32>
    %c0_53 = arith.constant 0 : index
    %c0_54 = arith.constant 0 : index
    %107 = vector.load %arg12[%c0_53, %c0_54] : memref<1x128xf32, #tpu.memory_space<vmem>>, vector<1x128xf32>
    %108 = vector.broadcast %107 : vector<1x128xf32> to vector<64x128xf32>
    %109 = arith.mulf %87, %108 : vector<64x128xf32>
    %110 = arith.addf %106, %109 : vector<64x128xf32>
    %c0_55 = arith.constant 0 : index
    %c0_56 = arith.constant 0 : index
    %111 = vector.load %arg13[%c0_55, %c0_56] : memref<64x128xf32, #tpu.memory_space<vmem>>, vector<64x128xf32>
    tpu.vector_store %arg13[%c0_55, %c0_56], %110 {strides = array<i32>} : memref<64x128xf32, #tpu.memory_space<vmem>>, vector<64x128xf32>,
    return
  }
}

</mosaic_0001>

<bundles_post_ra>
// kernel: _packed_outputs.1
= control target key start
LH: loop header
LB: loop body
LE: loop exit
PB: predicated region body
PF: predicated region fallthrough
CT: control target
= control target key end

     0   :  { %v2899_v1 = vmov 5   ;;  %v2900_v5 = vmov 1   ;;  %vm101_vm0 = vcmask 293888   ;;  %vm114_vm1 = vcmask 1041408   ;;  %s4043_s0 = inlined_call_operand.vmem [shape: bf16[64,36], index: 0, kind: input, shape index: {}]   ;;  %s4044_s1 = inlined_call_operand.vmem [shape: bf16[36,128], index: 1, kind: input, shape index: {}]   ;;  %s4045_s2 = inlined_call_operand.vmem [shape: f32[1,128], index: 2, kind: input, shape index: {}, may-alias: {2,4,6}]   ;;  %s4046_s3 = inlined_call_operand.vmem [shape: bf16[1152,128], index: 3, kind: input, shape index: {}]   ;;  %s4047_s4 = inlined_call_operand.vmem [shape: f32[1,128], index: 4, kind: input, shape index: {}, may-alias: {2,4,6}]   ;;  %s4048_s5 = inlined_call_operand.vmem [shape: bf16[128,128], index: 5, kind: input, shape index: {}]   ;;  %s4049_s6 = inlined_call_operand.vmem [shape: f32[1,128], index: 6, kind: input, shape index: {}, may-alias: {2,4,6}]   ;;  %s4050_s7 = inlined_call_operand.vmem [shape: f32[64,9], index: 7, kind: input, shape index: {}]   ;;  %s4051_s8 = inlined_call_operand.vmem [shape: f32[64,128], index: 8, kind: input, shape index: {}]   ;;  %s4052_s9 = inlined_call_operand.vmem [shape: f32[64,128], index: 9, kind: input, shape index: {}]   ;;  %s4053_s10 = inlined_call_operand.vmem [shape: f32[64,128], index: 10, kind: input, shape index: {}]   ;;  %s4054_s11 = inlined_call_operand.vmem [shape: f32[1,128], index: 11, kind: input, shape index: {}]   ;;  %s4055_s12 = inlined_call_operand.vmem [shape: f32[1,128], index: 12, kind: input, shape index: {}]   ;;  %s4056_s13 = inlined_call_operand.hbm [shape: f32[64,128], index: 13, kind: output, shape index: {}]  }
   0x1   :  { %v2985_v0 = vld [vmem:[%s4050_s7] sm:$0xff]  ;;  %2733 = vset.pattern.permute.xlu1 %v2899_v1  ;;  %v2994_v3 = vld [vmem:[%s4050_s7 + $0x8] sm:$0xff]  ;;  %2732 = vset.pattern.permute.xlu0 %v2900_v5  ;;  %v2774_v6 = vld [vmem:[%s4044_s1 + $0x10] ss:$0 sps:$4 sm:$0x33]   ;;  %v2901_v18 = vmov 0  }
   0x2   :  { %v2772_v2 = vld [vmem:[%s4044_s1] sm:$0xff]   ;;  %1109 = vperm.xlu1 %2733, %v2985_v0   ;;  %v2773_v4 = vld [vmem:[%s4044_s1 + $0x8] sm:$0xff]   ;;  %303 = vperm.xlu0 %2732, %v2985_v0   ;;  %v3012_v8 = vld [vmem:[%s4050_s7 + $0x18] sm:$0xff]  ;;  %v116_v9 = vsel %vm114_vm1, %v2774_v6, 0  ;;  %v2902_v19 = vmov 6   ;;  %v2903_v20 = vmov 2  }
   0x3   :  { %2400 = vmatprep.subr.bf16.mxu0 %v2772_v2  ;;  %v2775_v7 = vld [vmem:[%s4043_s0] sm:$0xff]   ;;  %v3017_v10 = vld [vmem:[%s4050_s7 + $0x10] sm:$0xff]  ;;  %v2776_v11 = vld [vmem:[%s4043_s0 + $0x8] sm:$0xff]  }
   0x4   :  { %2401 = vmatpush3.bf16.msra.mxu0 %v2772_v2  ;;  %2406 = vmatprep.mubr.msk.bf16.mxu0 %vm101_vm0, %v2775_v7  ;;  %v2777_v12 = vld [vmem:[%s4043_s0 + $0x10] sm:$0xff]   ;;  %v3030_v13 = vld [vmem:[%s4050_s7 + $0x28] sm:$0xff]  ;;  %v3037_v14 = vld [vmem:[%s4050_s7 + $0x20] sm:$0xff] }
   0x5   :  { %2402 = vmatprep.subr.bf16.mxu0 %v2773_v4  ;;  %v3043_v15 = vld [vmem:[%s4050_s7 + $0x30] sm:$0xff]  ;;  %v2778_v16 = vld [vmem:[%s4043_s0 + $0x18] sm:$0xff]  }
   0x6   :  { %1113 = vperm.xlu1 %2733, %v2994_v3   ;;  %307 = vperm.xlu0 %2732, %v2994_v3   ;;  %v3058_v17 = vld [vmem:[%s4050_s7 + $0x38] sm:$0xff] }
   0x8   :  { %2403 = vmatpush3.bf16.msra.mxu0 %v2773_v4 }
   0x9   :  { %2718 = vmatprep.subr.msk.bf16.mxu0 %vm114_vm1, %v2774_v6 }
   0xa   :  { %2734 = vset.pattern.permute.xlu1 %v2900_v5  ;;  %311 = vperm.xlu0 %2732, %v3017_v10  }
   0xb   :  { %315 = vperm.xlu1 %2734, %v3012_v8  }
   0xc   :  { %2405 = vmatpush3.bf16.msra.mxu0 %v116_v9 }
   0xe   :  { %323 = vperm.xlu0 %2732, %v3030_v13  }
   0xf   :  { %2735 = vset.pattern.permute.xlu1 %v2899_v1  ;;  %2407 = vmatmul.mubr.msk.bf16.vlgmr.msra.gmra.mrb[0].mxu0 %vm101_vm0, %v2776_v11 }
  0x10   :  { %1121 = vperm.xlu1 %2735, %v3012_v8   ;;  %2410 = vmatprep.mubr.msk.bf16.mxu0 %vm101_vm0, %v2777_v12 }
  0x12   :  { %327 = vperm.xlu0 %2732, %v3043_v15  }
  0x14   :  { %2736 = vset.pattern.permute.xlu1 %v2900_v5 }
  0x15   :  { %319 = vperm.xlu1 %2736, %v3037_v14  }
  0x16   :  { %2738 = vset.pattern.permute.xlu0 %v2899_v1 }
  0x17   :  { %2411 = vmatmul.mubr.msk.bf16.gmra.mrb[4].mxu0 %vm101_vm0, %v2778_v16  ;;  %1117 = vperm.xlu0 %2738, %v3017_v10  }
  0x19   :  { %2737 = vset.pattern.permute.xlu1 %v2899_v1 }
  0x1a   :  { %1125 = vperm.xlu1 %2737, %v3037_v14  }
  0x1b   :  { %1133 = vperm.xlu0 %2738, %v3043_v15  }
  0x1e   :  { %1129 = vperm.xlu1 %2737, %v3030_v13  }
  0x1f   :  { %2742 = vset.pattern.permute.xlu0 %v2901_v18 }
  0x20   :  { %241 = vperm.xlu0 %2742, %v2994_v3  }
  0x22   :  { %2739 = vset.pattern.permute.xlu1 %v2900_v5 }
  0x23   :  { %331 = vperm.xlu1 %2739, %v3058_v17  }
  0x24   :  { %246 = vperm.xlu0 %2742, %v3017_v10  }
  0x27   :  { %2740 = vset.pattern.permute.xlu1 %v2899_v1 }
  0x28   :  { %1137 = vperm.xlu1 %2740, %v3058_v17   ;;  %261 = vperm.xlu0 %2742, %v3030_v13  }
  0x2c   :  { %2741 = vset.pattern.permute.xlu1 %v2901_v18  ;;  %266 = vperm.xlu0 %2742, %v3043_v15  }
  0x2d   :  { %236 = vperm.xlu1 %2741, %v2985_v0  }
  0x30   :  { %2748 = vset.pattern.permute.xlu0 %v2902_v19 }
  0x31   :  { %2743 = vset.pattern.permute.xlu1 %v2902_v19  ;;  %1298 = vperm.xlu0 %2748, %v3017_v10  }
  0x32   :  { %1290 = vperm.xlu1 %2743, %v2985_v0  }
  0x35   :  { %1314 = vperm.xlu0 %2748, %v3043_v15  }
  0x36   :  { %1294 = vperm.xlu1 %2743, %v2994_v3  }
  0x39   :  { %2752 = vset.pattern.permute.xlu0 %v2903_v20 }
  0x3a   :  { %2744 = vset.pattern.permute.xlu1 %v2901_v18  ;;  %610 = vperm.xlu0 %2752, %v2994_v3  }
  0x3b   :  { %251 = vperm.xlu1 %2744, %v3012_v8  }
  0x3c   :  { %18 = vsyncpa [#allocation3], 0  ;;  %v2779_v21 = vld [vmem:[%s4046_s3 + $0x100] sm:$0xff]   ;;  %v2780_v22 = vld [vmem:[%s4046_s3 + $0x108] sm:$0xff]   ;;  %v2904_v23 = vmov 7   ;;  %v2905_v28 = vmov 8  }
  0x3d   :  { %2510 = vmatprep.subr.bf16.mxu1 %v2779_v21  ;;  %v2781_v24 = vld [vmem:[%s4046_s3 + $0x110] sm:$0xff]   ;;  %v2782_v25 = vld [vmem:[%s4046_s3 + $0x40] sm:$0xff]   ;;  %v2783_v26 = vld [vmem:[%s4046_s3 + $0x118] sm:$0xff]   ;;  %v2906_v31 = vmov 3   ;;  %s2907_s29 = smov 2   ;;  %s2908_s30 = smov 126  }
  0x3e   :  { %614 = vperm.xlu0 %2752, %v3017_v10   ;;  %2511 = vmatpush3.bf16.msra.mxu1 %v2779_v21  ;;  %v2784_v27 = vld [vmem:[%s4046_s3 + $0x48] sm:$0xff]   ;;  %v2785_v29 = vld [vmem:[%s4046_s3 + $0x120] sm:$0xff]   ;;  %v2786_v30 = vld [vmem:[%s4046_s3 + $0x50] sm:$0xff]  }
  0x3f   :  { %2745 = vset.pattern.permute.xlu1 %v2902_v19  ;;  %2512 = vmatprep.subr.bf16.mxu1 %v2780_v22  ;;  %v2787_v32 = vld [vmem:[%s4046_s3 + $0x128] sm:$0xff]   ;;  %v2788_v33 = vld [vmem:[%s4046_s3 + $0x58] sm:$0xff]   ;;  %v2789_v34 = vld [vmem:[%s4046_s3 + $0x130] sm:$0xff]  }
  0x40   :  { %1302 = vperm.xlu1 %2745, %v3012_v8   ;;  %2414 = vmatprep.subr.bf16.mxu0 %v2782_v25  ;;  %v2790_v35 = vld [vmem:[%s4046_s3 + $0x60] sm:$0xff]   ;;  %v2791_v36 = vld [vmem:[%s4046_s3 + $0x138] sm:$0xff]   ;;  %v2792_v37 = vld [vmem:[%s4046_s3 + $0x68] sm:$0xff]  }
  0x41   :  { %2415 = vmatpush3.bf16.msra.mxu0 %v2782_v25  ;;  %v3147_v38 = vld [vmem:[%s4046_s3 + $0x140] sm:$0xff]   ;;  %v2794_v39 = vld [vmem:[%s4046_s3 + $0x70] sm:$0xff]   ;;  %v2796_v40 = vld [vmem:[%s4046_s3 + $0x78] sm:$0xff]  }
  0x42   :  { %626 = vperm.xlu0 %2752, %v3030_v13   ;;  %2513 = vmatpush3.bf16.msra.mxu1 %v2780_v22  ;;  %v3164_v41 = vld [vmem:[%s4046_s3] sm:$0xff]  }
  0x43   :  { %2514 = vmatprep.subr.bf16.mxu1 %v2781_v24  ;;  %2416 = vmatprep.subr.bf16.mxu0 %v2784_v27 }
  0x44   :  { %2746 = vset.pattern.permute.xlu1 %v2901_v18 }
  0x45   :  { %256 = vperm.xlu1 %2746, %v3037_v14   ;;  %2417 = vmatpush3.bf16.msra.mxu0 %v2784_v27 }
  0x46   :  { %630 = vperm.xlu0 %2752, %v3043_v15   ;;  %2515 = vmatpush3.bf16.msra.mxu1 %v2781_v24 }
  0x47   :  { %2516 = vmatprep.subr.bf16.mxu1 %v2783_v26  ;;  %2418 = vmatprep.subr.bf16.mxu0 %v2786_v30 }
  0x49   :  { %2747 = vset.pattern.permute.xlu1 %v2902_v19  ;;  %2419 = vmatpush3.bf16.msra.mxu0 %v2786_v30 }
  0x4a   :  { %1306 = vperm.xlu1 %2747, %v3037_v14   ;;  %2758 = vset.pattern.permute.xlu0 %v2904_v23 }
  0x4b   :  { %1479 = vperm.xlu0 %2758, %v3017_v10   ;;  %2517 = vmatpush3.bf16.msra.mxu1 %v2783_v26 }
  0x4c   :  { %2518 = vmatprep.subr.bf16.mxu1 %v2785_v29  ;;  %2420 = vmatprep.subr.bf16.mxu0 %v2788_v33 }
  0x4d   :  { %2421 = vmatpush3.bf16.msra.mxu0 %v2788_v33 }
  0x4e   :  { %1310 = vperm.xlu1 %2747, %v3030_v13   ;;  %2422 = vmatprep.subr.bf16.mxu0 %v2790_v35 }
  0x4f   :  { %1495 = vperm.xlu0 %2758, %v3043_v15   ;;  %2519 = vmatpush3.bf16.msra.mxu1 %v2785_v29 }
  0x50   :  { %2520 = vmatprep.subr.bf16.mxu1 %v2787_v32 }
  0x51   :  { %2423 = vmatpush3.bf16.msra.mxu0 %v2790_v35 }
  0x52   :  { %2749 = vset.pattern.permute.xlu1 %v2901_v18  ;;  %2424 = vmatprep.subr.bf16.mxu0 %v2792_v37 }
  0x53   :  { %271 = vperm.xlu1 %2749, %v3058_v17   ;;  %2764 = vset.pattern.permute.xlu0 %v2905_v28 }
  0x54   :  { %1660 = vperm.xlu0 %2764, %v3017_v10   ;;  %2521 = vmatpush3.bf16.msra.mxu1 %v2787_v32 }
  0x55   :  { %2522 = vmatprep.subr.bf16.mxu1 %v2789_v34  ;;  %2425 = vmatpush3.bf16.msra.mxu0 %v2792_v37 }
  0x56   :  { %2426 = vmatprep.subr.bf16.mxu0 %v2794_v39 }
  0x57   :  { %2750 = vset.pattern.permute.xlu1 %v2902_v19 }
  0x58   :  { %1318 = vperm.xlu1 %2750, %v3058_v17   ;;  %2765 = vset.pattern.permute.xlu0 %v2906_v31 }
  0x59   :  { %791 = vperm.xlu0 %2765, %v2994_v3   ;;  %2523 = vmatpush3.bf16.msra.mxu1 %v2789_v34 }
  0x5a   :  { %2524 = vmatprep.subr.bf16.mxu1 %v2791_v36  ;;  %2427 = vmatpush3.bf16.msra.mxu0 %v2794_v39 }
  0x5b   :  { %2428 = vmatprep.subr.bf16.mxu0 %v2796_v40 }
  0x5c   :  { %2751 = vset.pattern.permute.xlu1 %v2903_v20 }
  0x5d   :  { %606 = vperm.xlu1 %2751, %v2985_v0   ;;  %795 = vperm.xlu0 %2765, %v3017_v10  }
  0x5e   :  { %2525 = vmatpush3.bf16.msra.mxu1 %v2791_v36  ;;  %2429 = vmatpush3.bf16.msra.mxu0 %v2796_v40 }
  0x5f   :  { %2534 = vmatprep.subr.bf16.mxu1 %v3147_v38  ;;  %2438 = vmatprep.subr.bf16.mxu0 %v3164_v41 }
  0x61   :  { %2753 = vset.pattern.permute.xlu1 %v2904_v23  ;;  %807 = vperm.xlu0 %2765, %v3030_v13  }
  0x62   :  { %1471 = vperm.xlu1 %2753, %v2985_v0  }
  0x65   :  { %811 = vperm.xlu0 %2765, %v3043_v15  }
  0x66   :  { %1475 = vperm.xlu1 %2753, %v2994_v3  }
  0x69   :  { %2770 = vset.pattern.permute.xlu0 %v2905_v28 }
  0x6a   :  { %2754 = vset.pattern.permute.xlu1 %v2903_v20  ;;  %1676 = vperm.xlu0 %2770, %v3043_v15  }
  0x6b   :  { %618 = vperm.xlu1 %2754, %v3012_v8  }
  0x6f   :  { %2755 = vset.pattern.permute.xlu1 %v2904_v23 }
  0x70   :  { %1483 = vperm.xlu1 %2755, %v3012_v8  }
  0x74   :  { %2756 = vset.pattern.permute.xlu1 %v2903_v20 }
  0x75   :  { %622 = vperm.xlu1 %2756, %v3037_v14  }
  0x79   :  { %2757 = vset.pattern.permute.xlu1 %v2904_v23 }
  0x7a   :  { %1487 = vperm.xlu1 %2757, %v3037_v14  }
  0x7e   :  { %1491 = vperm.xlu1 %2757, %v3030_v13  }
  0x81   :  { %v3170_v42 = vpop.permute.xlu1 %1109  ;;  %v3178_v44 = vpop.permute.xlu0 %303 }
  0x82   :  { %2759 = vset.pattern.permute.xlu1 %v2903_v20 }
  0x83   :  { %634 = vperm.xlu1 %2759, %v3058_v17  }
  0x85   :  { %v3174_v43 = vpop.permute.xlu1 %1113  ;;  %v3184_v46 = vpop.permute.xlu0 %307 }
  0x87   :  { %2760 = vset.pattern.permute.xlu1 %v2904_v23 }
  0x88   :  { %1499 = vperm.xlu1 %2760, %v3058_v17  }
  0x89   :  { %v3192_v49 = vpop.permute.xlu0 %311 }
  0x8a   :  { %v3180_v45 = vpop.permute.xlu1 %315 }
  0x8c   :  { %2761 = vset.pattern.permute.xlu1 %v2906_v31 }
  0x8d   :  { %787 = vperm.xlu1 %2761, %v2985_v0   ;;  %v3199_v51 = vpop.permute.xlu0 %323 }
  0x8f   :  { %v3186_v47 = vpop.permute.xlu1 %1121 }
  0x91   :  { %2762 = vset.pattern.permute.xlu1 %v2905_v28  ;;  %v3205_v53 = vpop.permute.xlu0 %327 }
  0x92   :  { %1652 = vperm.xlu1 %2762, %v2985_v0  }
  0x94   :  { %v3190_v48 = vpop.permute.xlu1 %319 }
  0x96   :  { %1656 = vperm.xlu1 %2762, %v2994_v3   ;;  %v3211_v55 = vpop.permute.xlu0 %1117 }
  0x99   :  { %v3195_v50 = vpop.permute.xlu1 %1125 }
  0x9a   :  { %2763 = vset.pattern.permute.xlu1 %v2906_v31  ;;  %v3219_v58 = vpop.permute.xlu0 %1133 }
  0x9b   :  { %799 = vperm.xlu1 %2763, %v3012_v8  }
  0x9d   :  { %v3201_v52 = vpop.permute.xlu1 %1129 }
  0x9f   :  { %2766 = vset.pattern.permute.xlu1 %v2905_v28  ;;  %v3225_v60 = vpop.permute.xlu0 %241 }
  0xa0   :  { %1664 = vperm.xlu1 %2766, %v3012_v8  }
  0xa2   :  { %v3207_v54 = vpop.permute.xlu1 %331 }
  0xa3   :  { %v3232_v62 = vpop.permute.xlu0 %246 }
  0xa4   :  { %2767 = vset.pattern.permute.xlu1 %v2906_v31 }
  0xa5   :  { %803 = vperm.xlu1 %2767, %v3037_v14  }
  0xa7   :  { %v3213_v56 = vpop.permute.xlu1 %1137  ;;  %v3236_v0 = vpop.permute.xlu0 %261 }
  0xa9   :  { %2768 = vset.pattern.permute.xlu1 %v2905_v28 }
  0xaa   :  { %1668 = vperm.xlu1 %2768, %v3037_v14   ;;  %v215_v14 = vlaneseq }
  0xab   :  { %v3242_v3 = vpop.permute.xlu0 %266 }
  0xac   :  { %v3217_v57 = vpop.permute.xlu1 %236  ;;  %v3265_v22 = vshrl.u32 %v215_v14, 7 }
  0xae   :  { %1672 = vperm.xlu1 %2768, %v3030_v13   ;;  %v2177_v13 = vld [vmem:[%s4045_s2] ss:$0 sm:$0xff]  ;;  %vm217_vm2 = vcmp.lt.s32.totalorder %v3265_v22, 1  ;;  %vm596_vm3 = vcmp.lt.s32.totalorder %v3265_v22, 7 }
  0xb0   :  { %v3246_v5 = vpop.permute.xlu0 %1298 }
  0xb1   :  { %v3222_v59 = vpop.permute.xlu1 %1290 }
  0xb2   :  { %2769 = vset.pattern.permute.xlu1 %v2906_v31 }
  0xb3   :  { %815 = vperm.xlu1 %2769, %v3058_v17  }
  0xb4   :  { %v3250_v7 = vpop.permute.xlu0 %1314 }
  0xb5   :  { %v3228_v61 = vpop.permute.xlu1 %1294  ;;  %4064 = vst [vmem:[#allocation5_spill] sm:$0xff] %v3250_v7 }
  0xb7   :  { %2771 = vset.pattern.permute.xlu1 %v2905_v28 }
  0xb8   :  { %1680 = vperm.xlu1 %2771, %v3058_v17  }
  0xb9   :  { %v3254_v9 = vpop.permute.xlu0 %610 }
  0xba   :  { %v3234_v63 = vpop.permute.xlu1 %251  ;;  %4065 = vst [vmem:[#allocation6_spill] sm:$0xff] %v3254_v9 }
  0xbd   :  { %v615_v12 = vpop.permute.xlu0 %614 }
  0xbf   :  { %v3238_v1 = vpop.permute.xlu1 %1302 }
  0xc1   :  { %v3263_v17 = vpop.permute.xlu0 %626 }
  0xc4   :  { %v3240_v2 = vpop.permute.xlu1 %256 }
  0xc5   :  { %v3277_v31 = vpop.permute.xlu0 %630 }
  0xc9   :  { %v3244_v4 = vpop.permute.xlu1 %1306 }
  0xca   :  { %v1480_v9 = vpop.permute.xlu0 %1479 }
  0xcd   :  { %v3248_v6 = vpop.permute.xlu1 %1310 }
  0xd2   :  { %v3252_v8 = vpop.permute.xlu1 %271 }
  0xd7   :  { %v3256_v10 = vpop.permute.xlu1 %1318 }
  0xd8   :  { %4066 = vst [vmem:[#allocation7_spill] sm:$0xff] %v3256_v10 }
  0xdc   :  { %v3258_v11 = vpop.permute.xlu1 %606 }
  0xdd   :  { %4067 = vst [vmem:[#allocation8_spill] sm:$0xff] %v3258_v11 }
  0xe1   :  { %v1472_v15 = vpop.permute.xlu1 %1471 }
  0xe2   :  { %v2408_v16 = vpop.f32.mrb[0].mxu0 }
  0xe3   :  { %v161_v18 = vadd.f32 %v2408_v16, %v2177_v13  ;;  %v152_v19 = vpop.f32.mrb[1].mxu0 }
  0xe4   :  { %v153_v20 = vadd.f32 %v2177_v13, %v152_v19  ;;  %v2409_v21 = vpop.f32.mrb[2].mxu0 }
  0xe5   :  { %v3267_v23 = vmax.f32 %v161_v18, 0.0  ;;  %v164_v24 = vadd.f32 %v2409_v21, %v2177_v13  ;;  %v155_v25 = vpop.f32.mrb[3].mxu0  ;;  %v1476_v26 = vpop.permute.xlu1 %1475 }
  0xe6   :  { %v156_v27 = vadd.f32 %v2177_v13, %v155_v25  ;;  %v3271_v29 = vmax.f32 %v153_v20, 0.0 }
  0xe7   :  { %v3269_v28 = vmax.f32 %v164_v24, 0.0  ;;  %v3280_v32 = vmul.f32 %v1476_v26, %v3267_v23  ;;  %v590_v33 = vrot.slane %v3267_v23, 1  ;;  %v4058_v39 = vrot.slane %v3267_v23, 7 }
  0xe8   :  { %v3273_v30 = vmax.f32 %v156_v27, 0.0  ;;  %v337_v24 = vmul.f32 %v3180_v45, %v3267_v23 }
  0xe9   :  { %4068 = vst [vmem:[#allocation9_spill] sm:$0xff] %v3280_v32  ;;  %v591_v34 = vrot.slane %v3269_v28, 1  ;;  %v968_v35 = vpack.c.bf16 %v3269_v28, %v3267_v23 }
  0xea   :  { %v3287_v36 = vmul.f32 %v1472_v15, %v3273_v30  ;;  %v4059_v37 = vrot.slane %v3273_v30, 7  ;;  %v2412_v40 = vpop.f32.mrb[4].mxu0  ;;  %v619_v14 = vpop.permute.xlu1 %618  ;;  %v589_v16 = vrot.slane %v3273_v30, 1  ;;  %v3294_v18 = vmul.f32 %v3192_v49, %v3273_v30 }
  0xeb   :  { %v177_v19 = vadd.f32 %v2412_v40, %v2177_v13  ;;  %v3298_v20 = vsel %vm596_vm3, %v590_v33, %v591_v34  ;;  %v168_v21 = vpop.f32.mrb[5].mxu0  ;;  %v967_v15 = vpack.c.bf16 %v3273_v30, %v3271_v29  ;;  %v2795_v40 = vld [vmem:[%s4046_s3 + $0x148] sm:$0xff]  }
  0xec   :  { %4069 = vst [vmem:[#allocation10_spill] sm:$0xff] %v3287_v36  ;;  %v3310_v49 = vsel %vm217_vm2, %v4059_v37, %v4058_v39  ;;  %v3314_v25 = vsel %vm596_vm3, %v589_v16, %v590_v33  ;;  %v3317_v26 = vmul.f32 %v619_v14, %v3298_v20  ;;  %v2413_v27 = vpop.f32.mrb[6].mxu0  ;;  %v588_v39 = vrot.slane %v3271_v29, 1 }
  0xed   :  { %2526 = vmatprep.mubr.bf16.mxu1 %v967_v15  ;;  %v171_v36 = vpop.f32.mrb[7].mxu0  ;;  %v3326_v37 = vmul.f32 %v615_v12, %v3314_v25  ;;  %v169_v33 = vadd.f32 %v2177_v13, %v168_v21  ;;  %v180_v32 = vadd.f32 %v2413_v27, %v2177_v13  ;;  %v335_v14 = vmul.f32 %v3184_v46, %v3271_v29 }
  0xee   :  { %2527 = vmatmul.mubr.bf16.vlgmr.msra.gmra.mrb[0].mxu1 %v968_v35  ;;  %v3330_v11 = vmax.f32 %v177_v19, 0.0  ;;  %v172_v10 = vadd.f32 %v2177_v13, %v171_v36  ;;  %v343_v15 = vpack.c.bf16 %v337_v24, %v3294_v18  ;;  %v3336_v7 = vsel %vm596_vm3, %v588_v39, %v589_v16 }
  0xef   :  { %4070 = vst [vmem:[#allocation11_spill] sm:$0xff] %v3326_v37  ;;  %2535 = vmatpush3.bf16.msra.mxu1 %v3147_v38  ;;  %v1484_v45 = vpop.permute.xlu1 %1483  ;;  %v3340_v35 = vmax.f32 %v169_v33, 0.0  ;;  %v3342_v21 = vmax.f32 %v180_v32, 0.0  ;;  %v3345_v46 = vmul.f32 %v1480_v9, %v3269_v28  ;;  %v2797_v38 = vld [vmem:[%s4046_s3 + $0x150] sm:$0xff]   ;;  %v1140_v16 = vmul.f32 %v3170_v42, %v3336_v7 }
  0xf0   :  { %2536 = vmatprep.subr.bf16.mxu1 %v2795_v40  ;;  %v3350_v13 = vmax.f32 %v172_v10, 0.0  ;;  %v213_v36 = vrot.slane %v3330_v11, 7  ;;  %v1141_v18 = vmul.f32 %v3174_v43, %v3314_v25  ;;  %v3382_v10 = vmul.f32 %v3234_v63, %v3310_v49  ;;  %v2800_v63 = vld [vmem:[%s4046_s3 + $0x8] sm:$0xff]  }
  0xf1   :  { %4071 = vst [vmem:[#allocation12_spill] sm:$0xff] %v3345_v46  ;;  %v3358_v32 = vmul.f32 %v1484_v45, %v3340_v35  ;;  %v595_v9 = vrot.slane %v3342_v21, 1  ;;  %v592_v19 = vrot.slane %v3340_v35, 1  ;;  %v334_v24 = vmul.f32 %v3178_v44, %v3342_v21 }
  0xf2   :  { %v593_v27 = vrot.slane %v3350_v13, 1  ;;  %v969_v42 = vpack.c.bf16 %v3350_v13, %v3340_v35  ;;  %v970_v43 = vpack.c.bf16 %v3342_v21, %v3330_v11  ;;  %v3386_v37 = vmul.f32 %v3211_v55, %v3298_v20 }
  0xf3   :  { %4072 = vst [vmem:[#allocation13_spill] sm:$0xff] %v3358_v32  ;;  %2537 = vmatpush3.bf16.msra.mxu1 %v2795_v40  ;;  %v3374_v45 = vsel %vm596_vm3, %v595_v9, %v588_v39  ;;  %v3378_v44 = vsel %vm596_vm3, %v591_v34, %v592_v19  ;;  %v342_v40 = vpack.c.bf16 %v335_v14, %v334_v24  ;;  %v4073_v33 = vrot.slane %v3350_v13, 7  ;;  %v2799_v14 = vld [vmem:[%s4046_s3 + $0x158] sm:$0xff]  }
  0xf4   :  { %v623_v12 = vpop.permute.xlu1 %622  ;;  %2538 = vmatprep.subr.bf16.mxu1 %v2797_v38  ;;  %2530 = vmatprep.mubr.bf16.mxu1 %v969_v42  ;;  %v338_v34 = vmul.f32 %v3190_v48, %v3269_v28  ;;  %v3404_v55 = vmul.f32 %v3213_v56, %v3374_v45  ;;  %v3408_v24 = vsel %vm596_vm3, %v592_v19, %v593_v27  ;;  %v594_v42 = vrot.slane %v3330_v11, 1 }
  0xf5   :  { %v3392_v39 = vsel %vm217_vm2, %v4073_v33, %v213_v36  ;;  %2430 = vmatprep.mubr.bf16.mxu0 %v342_v40  ;;  %v341_v48 = vmul.f32 %v3207_v54, %v3330_v11  ;;  %v3414_v33 = vmul.f32 %v623_v12, %v3378_v44  ;;  %v3418_v46 = vmul.f32 %v3263_v17, %v3408_v24 }
  0xf6   :  { %v3422_v56 = vmul.f32 %v3186_v47, %v3378_v44  ;;  %2531 = vmatmul.mubr.bf16.gmra.mrb[4].mxu1 %v970_v43  ;;  %2431 = vmatmul.mubr.bf16.vlgmr.msra.gmra.mrb[8].mxu0 %v343_v15  ;;  %v214_v19 = vrot.slane %v3342_v21, 7  ;;  %v1148_v54 = vpack.c.bf16 %v1141_v18, %v1140_v16  ;;  %v339_v12 = vmul.f32 %v3199_v51, %v3340_v35  ;;  %v2802_v18 = vld [vmem:[%s4046_s3 + $0x10] sm:$0xff]  }
  0xf7   :  { %2539 = vmatpush3.bf16.msra.mxu1 %v2797_v38  ;;  %2439 = vmatpush3.bf16.msra.mxu0 %v3164_v41  ;;  %v340_v40 = vmul.f32 %v3205_v53, %v3350_v13  ;;  %v207_v17 = vrot.slane %v3271_v29, 7  ;;  %v2801_v41 = vld [vmem:[%s4046_s3 + $0x160] sm:$0xff]   ;;  %v210_v53 = vrot.slane %v3269_v28, 7  ;;  %v211_v15 = vrot.slane %v3340_v35, 7 }
  0xf8   :  { %2540 = vmatprep.subr.bf16.mxu1 %v2799_v14  ;;  %2440 = vmatprep.subr.bf16.mxu0 %v2800_v63  ;;  %v3440_v51 = vsel %vm217_vm2, %v213_v36, %v214_v19  ;;  %v344_v16 = vpack.c.bf16 %v339_v12, %v338_v34  ;;  %v3457_v28 = vsel %vm596_vm3, %v594_v42, %v595_v9 }
  0xf9   :  { %v1488_v38 = vpop.permute.xlu1 %1487  ;;  %2550 = vmatprep.mubr.bf16.mxu1 %v1148_v54  ;;  %v345_v43 = vpack.c.bf16 %v341_v48, %v340_v40  ;;  %v3448_v47 = vsel %vm217_vm2, %v214_v19, %v207_v17  ;;  %v274_v32 = vmul.f32 %v3217_v57, %v3440_v51  ;;  %v3461_v34 = vsel %vm596_vm3, %v593_v27, %v594_v42  ;;  %v2803_v27 = vld [vmem:[%s4046_s3 + $0x168] sm:$0xff]  }
  0xfa   :  { %v275_v36 = vmul.f32 %v3225_v60, %v3448_v47  ;;  %v3465_v48 = vmul.f32 %v3228_v61, %v3310_v49  ;;  %2434 = vmatprep.mubr.bf16.mxu0 %v344_v16  ;;  %v3468_v35 = vmul.f32 %v1488_v38, %v3350_v13  ;;  %v3472_v57 = vmul.f32 %v3219_v58, %v3457_v28 }
  0xfb   :  { %2541 = vmatpush3.bf16.msra.mxu1 %v2799_v14  ;;  %2441 = vmatpush3.bf16.msra.mxu0 %v2800_v63  ;;  %v4074_v61 = vrot.slane %v3273_v30, 7  ;;  %v3485_v42 = vmul.f32 %v3195_v50, %v3408_v24  ;;  %v3489_v58 = vmul.f32 %v3252_v8, %v3392_v39  ;;  %v2804_v30 = vld [vmem:[%s4046_s3 + $0x18] sm:$0xff]   ;;  %v3503_v50 = vmul.f32 %v3201_v52, %v3461_v34  ;;  %v1496_v52 = vpop.permute.xlu0 %1495 }
  0xfc   :  { %2542 = vmatprep.subr.bf16.mxu1 %v2801_v41  ;;  %v282_v9 = vpack.c.bf16 %v275_v36, %v274_v32  ;;  %2442 = vmatprep.subr.bf16.mxu0 %v2802_v18  ;;  %v1151_v8 = vpack.c.bf16 %v3404_v55, %v3472_v57  ;;  %v3513_v19 = vsel %vm217_vm2, %v210_v53, %v211_v15  ;;  %v4075_v54 = vrot.slane %v3267_v23, 7  ;;  %v2805_v23 = vld [vmem:[%s4046_s3 + $0x170] sm:$0xff]  }
  0xfd   :  { %v1492_v60 = vpop.permute.xlu1 %1491  ;;  %v3481_v14 = vsel %vm217_vm2, %v207_v17, %v4074_v61  ;;  %v1150_v40 = vpack.c.bf16 %v3503_v50, %v3485_v42  ;;  %v3563_v36 = vmul.f32 %v3277_v31, %v3461_v34 }
  0xfe   :  { %v3492_v32 = vmul.f32 %v1492_v60, %v3330_v11  ;;  %v3499_v63 = vmul.f32 %v3232_v62, %v3481_v14  ;;  %2435 = vmatmul.mubr.bf16.gmra.mrb[12].mxu0 %v345_v43  ;;  %v3509_v11 = vmul.f32 %v3222_v59, %v3481_v14  ;;  %v3519_v62 = vsel %vm217_vm2, %v4075_v54, %v210_v53 }
  0xff   :  { %2543 = vmatpush3.bf16.msra.mxu1 %v2801_v41  ;;  %2454 = vmatprep.mubr.bf16.mxu0 %v282_v9  ;;  %v3534_v38 = vmul.f32 %v3240_v2, %v3519_v62  ;;  %v3538_v41 = vmul.f32 %v3236_v0, %v3513_v19  ;;  %v3542_v53 = vmul.f32 %v3248_v6, %v3392_v39  ;;  %v4076_v0 = vrot.slane %v3350_v13, 7  ;;  %v4077_v9 = vld [vmem:[#allocation5_spill] sm:$0xff]  ;;  %v3591_v61 = vpop.permute.xlu0 %1660 }
 0x100   :  { %v1512_v12 = vpack.c.bf16 %v3492_v32, %v3468_v35  ;;  %v283_v59 = vpack.c.bf16 %v3382_v10, %v3499_v63  ;;  %2443 = vmatpush3.bf16.msra.mxu0 %v2802_v18  ;;  %2544 = vmatprep.subr.bf16.mxu1 %v2803_v27  ;;  %v1329_v17 = vpack.c.bf16 %v3465_v48, %v3509_v11  ;;  %v2806_v18 = vld [vmem:[%s4046_s3 + $0x20] sm:$0xff]   ;;  %v4080_v10 = vld [vmem:[#allocation8_spill] sm:$0xff]  ;;  %v2818_v48 = vld [vmem:[%s4046_s3 + $0x90] sm:$0xff]  }
 0x101   :  { %2444 = vmatprep.subr.bf16.mxu0 %v2804_v30  ;;  %v3549_v43 = vmul.f32 %v3246_v5, %v3519_v62  ;;  %v3553_v2 = vmul.f32 %v3238_v1, %v3513_v19  ;;  %v3559_v6 = vsel %vm217_vm2, %v211_v15, %v4076_v0  ;;  %v284_v5 = vpack.c.bf16 %v3538_v41, %v3534_v38  ;;  %v2807_v15 = vld [vmem:[%s4046_s3 + $0x178] sm:$0xff]   ;;  %v2809_v0 = vld [vmem:[%s4046_s3 + $0x180] sm:$0xff]   ;;  %v2848_v32 = vld [vmem:[%s4046_s3 + $0x228] sm:$0xff]  }
 0x102   :  { %v635_v16 = vpop.permute.xlu1 %634  ;;  %v3572_v1 = vmul.f32 %v3242_v3, %v3559_v6  ;;  %v3578_v13 = vmul.f32 %v3244_v4, %v3559_v6  ;;  %v2808_v4 = vld [vmem:[%s4046_s3 + $0x28] sm:$0xff]   ;;  %v3603_v38 = vmul.f32 %v1496_v52, %v3342_v21  ;;  %v2810_v21 = vld [vmem:[%s4046_s3 + $0x30] sm:$0xff]   ;;  %v637_v63 = vmul.f32 %v4080_v10, %v3374_v45  ;;  %v2828_v10 = vld [vmem:[%s4046_s3 + $0xb8] sm:$0xff]  }
 0x103   :  { %v3566_v60 = vmul.f32 %v635_v16, %v3457_v28  ;;  %2545 = vmatpush3.bf16.msra.mxu1 %v2803_v27  ;;  %v1330_v22 = vpack.c.bf16 %v3553_v2, %v3549_v43  ;;  %v3589_v27 = vmul.f32 %v4077_v9, %v3440_v51  ;;  %v792_v52 = vpop.permute.xlu0 %791  ;;  %v2847_v35 = vld [vmem:[%s4046_s3 + $0x220] sm:$0xff]  }
 0x104   :  { %2445 = vmatpush3.bf16.msra.mxu0 %v2804_v30  ;;  %2546 = vmatprep.subr.bf16.mxu1 %v2805_v23  ;;  %v285_v3 = vpack.c.bf16 %v3489_v58, %v3572_v1  ;;  %v1331_v42 = vpack.c.bf16 %v3542_v53, %v3578_v13  ;;  %v4078_v30 = vld [vmem:[#allocation7_spill] sm:$0xff]  ;;  %v2822_v58 = vld [vmem:[%s4046_s3 + $0xa0] sm:$0xff]  }
 0x105   :  { %v648_v31 = vpack.c.bf16 %v3566_v60, %v3563_v36  ;;  %2446 = vmatprep.subr.bf16.mxu0 %v2806_v18  ;;  %v3600_v50 = vmul.f32 %v4078_v30, %v3448_v47  ;;  %v2811_v30 = vld [vmem:[%s4046_s3 + $0x188] sm:$0xff]   ;;  %v2830_v53 = vld [vmem:[%s4046_s3 + $0xc0] sm:$0xff]   ;;  %v2839_v36 = vld [vmem:[%s4046_s3 + $0x1f8] sm:$0xff]  }
 0x106   :  { %v2840_v60 = vld [vmem:[%s4046_s3 + $0xe8] sm:$0xff]  }
 0x107   :  { %v1500_v54 = vpop.permute.xlu1 %1499  ;;  %2547 = vmatpush3.bf16.msra.mxu1 %v2805_v23  ;;  %v1332_v16 = vpack.c.bf16 %v3600_v50, %v3589_v27  ;;  %v796_v55 = vpop.permute.xlu0 %795  ;;  %v2833_v27 = vld [vmem:[%s4046_s3 + $0x1e0] sm:$0xff]   ;;  %v4087_v50 = vpack.c.bf16 %v3418_v46, %v3414_v33  ;;  %v2837_v46 = vld [vmem:[%s4046_s3 + $0x1f0] sm:$0xff]  }
 0x108   :  { %v3606_v41 = vmul.f32 %v1500_v54, %v3271_v29  ;;  %2447 = vmatpush3.bf16.msra.mxu0 %v2806_v18  ;;  %2548 = vmatprep.subr.bf16.mxu1 %v2807_v15  ;;  %v3622_v18 = vmul.f32 %v792_v52, %v3481_v14  ;;  %v2812_v54 = vld [vmem:[%s4046_s3 + $0x38] sm:$0xff]   ;;  %v2814_v52 = vld [vmem:[%s4046_s3 + $0x80] sm:$0xff]  }
 0x109   :  { %2448 = vmatprep.subr.bf16.mxu0 %v2808_v4  ;;  %v2838_v33 = vld [vmem:[%s4046_s3 + $0xe0] sm:$0xff]  }
 0x10a   :  { %v1513_v9 = vpack.c.bf16 %v3606_v41, %v3603_v38  ;;  %v2850_v38 = vld [vmem:[%s4046_s3 + $0x238] sm:$0xff]  }
 0x10b   :  { %2549 = vmatpush3.bf16.msra.mxu1 %v2807_v15 }
 0x10c   :  { %v788_v29 = vpop.permute.xlu1 %787  ;;  %2449 = vmatpush3.bf16.msra.mxu0 %v2808_v4  ;;  %2558 = vmatprep.subr.bf16.mxu1 %v2809_v0  ;;  %v2813_v4 = vld [vmem:[%s4046_s3 + $0x190] sm:$0xff]  }
 0x10d   :  { %v3619_v23 = vmul.f32 %v788_v29, %v3448_v47  ;;  %2450 = vmatprep.subr.bf16.mxu0 %v2810_v21  ;;  %v4079_v47 = vpack.c.bf16 %v3422_v56, %v3386_v37 }
 0x10f   :  { %v826_v15 = vpack.c.bf16 %v3622_v18, %v3619_v23  ;;  %2551 = vmatmul.mubr.bf16.vlgmr.msra.gmra.mrb[0].mxu1 %v4079_v47  ;;  %v2842_v23 = vld [vmem:[%s4046_s3 + $0xf0] sm:$0xff]   ;;  %v2843_v18 = vld [vmem:[%s4046_s3 + $0x208] sm:$0xff]  }
 0x110   :  { %2554 = vmatprep.mubr.bf16.mxu1 %v1150_v40  ;;  %2559 = vmatpush3.bf16.msra.mxu1 %v2809_v0  ;;  %v2815_v40 = vld [vmem:[%s4046_s3 + $0x198] sm:$0xff]   ;;  %v2816_v0 = vld [vmem:[%s4046_s3 + $0x88] sm:$0xff]  }
 0x111   :  { %2451 = vmatpush3.bf16.msra.mxu0 %v2810_v21  ;;  %2560 = vmatprep.subr.bf16.mxu1 %v2811_v30  ;;  %v1653_v14 = vpop.permute.xlu1 %1652 }
 0x112   :  { %2452 = vmatprep.subr.bf16.mxu0 %v2812_v54  ;;  %v3642_v37 = vmul.f32 %v1653_v14, %v3314_v25  ;;  %v2821_v14 = vld [vmem:[%s4046_s3 + $0x1b0] sm:$0xff]  }
 0x114   :  { %2561 = vmatpush3.bf16.msra.mxu1 %v2811_v30  ;;  %v2820_v30 = vld [vmem:[%s4046_s3 + $0x98] sm:$0xff]  }
 0x115   :  { %2453 = vmatpush3.bf16.msra.mxu0 %v2812_v54  ;;  %2562 = vmatprep.subr.bf16.mxu1 %v2813_v4  ;;  %v1657_v29 = vpop.permute.xlu1 %1656  ;;  %v3693_v54 = vmul.f32 %v3591_v61, %v3378_v44  ;;  %v808_v44 = vpop.permute.xlu0 %807  ;;  %v2823_v61 = vld [vmem:[%s4046_s3 + $0x1b8] sm:$0xff]  }
 0x116   :  { %v3645_v56 = vmul.f32 %v1657_v29, %v3298_v20  ;;  %2462 = vmatprep.subr.bf16.mxu0 %v2814_v52  ;;  %v2817_v20 = vld [vmem:[%s4046_s3 + $0x1a0] sm:$0xff]   ;;  %v2824_v29 = vld [vmem:[%s4046_s3 + $0xa8] sm:$0xff]  }
 0x117   :  { %2555 = vmatmul.mubr.bf16.gmra.mrb[4].mxu1 %v1151_v8  ;;  %v3668_v8 = vmul.f32 %v796_v55, %v3310_v49 }
 0x118   :  { %v1691_v25 = vpack.c.bf16 %v3645_v56, %v3642_v37  ;;  %2455 = vmatmul.mubr.bf16.vlgmr.msra.gmra.mrb[8].mxu0 %v283_v59  ;;  %2563 = vmatpush3.bf16.msra.mxu1 %v2813_v4 }
 0x119   :  { %2574 = vmatprep.mubr.bf16.mxu1 %v1329_v17  ;;  %2458 = vmatprep.mubr.bf16.mxu0 %v284_v5  ;;  %v4081_v17 = vld [vmem:[#allocation6_spill] sm:$0xff] }
 0x11a   :  { %2463 = vmatpush3.bf16.msra.mxu0 %v2814_v52  ;;  %2564 = vmatprep.subr.bf16.mxu1 %v2815_v40  ;;  %v800_v57 = vpop.permute.xlu1 %799  ;;  %v638_v49 = vmul.f32 %v4081_v17, %v3336_v7  ;;  %v2819_v5 = vld [vmem:[%s4046_s3 + $0x1a8] sm:$0xff]  }
 0x11b   :  { %2464 = vmatprep.subr.bf16.mxu0 %v2816_v0  ;;  %v3673_v59 = vmul.f32 %v800_v57, %v3519_v62 }
 0x11c   :  { %2565 = vmatpush3.bf16.msra.mxu1 %v2815_v40  ;;  %v645_v62 = vpack.c.bf16 %v638_v49, %v637_v63  ;;  %v2826_v40 = vld [vmem:[%s4046_s3 + $0xb0] sm:$0xff]  }
 0x11d   :  { %v827_v11 = vpack.c.bf16 %v3673_v59, %v3668_v8  ;;  %2566 = vmatprep.subr.bf16.mxu1 %v2817_v20  ;;  %v4085_v49 = vld [vmem:[#allocation11_spill] sm:$0xff]  ;;  %v2851_v8 = vld [vmem:[%s4048_s5] sm:$0xff]   ;;  %v2852_v59 = vld [vmem:[%s4048_s5 + $0x8] sm:$0xff]  }
 0x11e   :  { %2465 = vmatpush3.bf16.msra.mxu0 %v2816_v0 }
 0x11f   :  { %2466 = vmatprep.subr.bf16.mxu0 %v2818_v48  ;;  %v1665_v21 = vpop.permute.xlu1 %1664 }
 0x120   :  { %2459 = vmatmul.mubr.bf16.gmra.mrb[12].mxu0 %v285_v3  ;;  %2567 = vmatpush3.bf16.msra.mxu1 %v2817_v20  ;;  %v3696_v47 = vmul.f32 %v1665_v21, %v3408_v24  ;;  %v3710_v3 = vmul.f32 %v808_v44, %v3559_v6  ;;  %v2825_v6 = vld [vmem:[%s4046_s3 + $0x1c0] sm:$0xff]   ;;  %v2827_v20 = vld [vmem:[%s4046_s3 + $0x1c8] sm:$0xff]   ;;  %v4089_v21 = vld [vmem:[#allocation12_spill] sm:$0xff] }
 0x121   :  { %2478 = vmatprep.mubr.bf16.mxu0 %v645_v62  ;;  %2568 = vmatprep.subr.bf16.mxu1 %v2819_v5  ;;  %v2836_v62 = vld [vmem:[%s4046_s3 + $0xd8] sm:$0xff]  }
 0x122   :  { %2467 = vmatpush3.bf16.msra.mxu0 %v2818_v48  ;;  %v1692_v4 = vpack.c.bf16 %v3696_v47, %v3693_v54  ;;  %v4083_v48 = vld [vmem:[#allocation10_spill] sm:$0xff]  ;;  %v2846_v44 = vld [vmem:[%s4046_s3 + $0x218] sm:$0xff]   ;;  %v2857_v47 = vld [vmem:[%s4048_s5 + $0x30] sm:$0xff]  }
 0x123   :  { %2468 = vmatprep.subr.bf16.mxu0 %v2820_v30  ;;  %v2856_v54 = vld [vmem:[%s4048_s5 + $0x28] sm:$0xff]  }
 0x124   :  { %2569 = vmatpush3.bf16.msra.mxu1 %v2819_v5  ;;  %v804_v1 = vpop.permute.xlu1 %803  ;;  %v4086_v5 = vpack.c.bf16 %v3317_v26, %v4085_v49  ;;  %v2835_v26 = vld [vmem:[%s4046_s3 + $0x1e8] sm:$0xff]  }
 0x125   :  { %v3707_v24 = vmul.f32 %v804_v1, %v3513_v19  ;;  %2570 = vmatprep.subr.bf16.mxu1 %v2821_v14 }
 0x126   :  { %2469 = vmatpush3.bf16.msra.mxu0 %v2820_v30 }
 0x127   :  { %v828_v52 = vpack.c.bf16 %v3710_v3, %v3707_v24  ;;  %2470 = vmatprep.subr.bf16.mxu0 %v2822_v58 }
 0x128   :  { %2571 = vmatpush3.bf16.msra.mxu1 %v2821_v14  ;;  %v2844_v14 = vld [vmem:[%s4046_s3 + $0xf8] sm:$0xff]  }
 0x129   :  { %2572 = vmatprep.subr.bf16.mxu1 %v2823_v61  ;;  %v1669_v19 = vpop.permute.xlu1 %1668 }
 0x12a   :  { %2471 = vmatpush3.bf16.msra.mxu0 %v2822_v58  ;;  %v3730_v55 = vmul.f32 %v1669_v19, %v3461_v34  ;;  %v812_v34 = vpop.permute.xlu0 %811  ;;  %v2845_v58 = vld [vmem:[%s4046_s3 + $0x210] sm:$0xff]  }
 0x12b   :  { %2472 = vmatprep.subr.bf16.mxu0 %v2824_v29  ;;  %v3750_v2 = vmul.f32 %v812_v34, %v3392_v39  ;;  %v2832_v39 = vld [vmem:[%s4046_s3 + $0xc8] sm:$0xff]  }
 0x12c   :  { %2573 = vmatpush3.bf16.msra.mxu1 %v2823_v61 }
 0x12d   :  { %2582 = vmatprep.subr.bf16.mxu1 %v2825_v6  ;;  %v1673_v0 = vpop.permute.xlu1 %1672 }
 0x12e   :  { %2473 = vmatpush3.bf16.msra.mxu0 %v2824_v29  ;;  %v3733_v57 = vmul.f32 %v1673_v0, %v3457_v28  ;;  %v2829_v28 = vld [vmem:[%s4046_s3 + $0x1d0] sm:$0xff]   ;;  %v2261_v0 = vld [vmem:[%s4047_s4] ss:$0 sm:$0xff] }
 0x12f   :  { %2575 = vmatmul.mubr.bf16.vlgmr.msra.gmra.mrb[0].mxu1 %v1330_v22  ;;  %2474 = vmatprep.subr.bf16.mxu0 %v2826_v40 }
 0x130   :  { %v1693_v63 = vpack.c.bf16 %v3733_v57, %v3730_v55  ;;  %2578 = vmatprep.mubr.bf16.mxu1 %v1331_v42  ;;  %2583 = vmatpush3.bf16.msra.mxu1 %v2825_v6  ;;  %v2831_v42 = vld [vmem:[%s4046_s3 + $0x1d8] sm:$0xff]  }
 0x131   :  { %2584 = vmatprep.subr.bf16.mxu1 %v2827_v20 }
 0x132   :  { %2475 = vmatpush3.bf16.msra.mxu0 %v2826_v40  ;;  %v816_v43 = vpop.permute.xlu1 %815 }
 0x133   :  { %2476 = vmatprep.subr.bf16.mxu0 %v2828_v10  ;;  %v3753_v22 = vmul.f32 %v816_v43, %v3440_v51  ;;  %v4082_v51 = vld [vmem:[#allocation9_spill] sm:$0xff] }
 0x134   :  { %2585 = vmatpush3.bf16.msra.mxu1 %v2827_v20  ;;  %v4084_v17 = vpack.c.bf16 %v4082_v51, %v4083_v48 }
 0x135   :  { %v829_v13 = vpack.c.bf16 %v3753_v22, %v3750_v2  ;;  %2586 = vmatprep.subr.bf16.mxu1 %v2829_v28 }
 0x136   :  { %2477 = vmatpush3.bf16.msra.mxu0 %v2828_v10 }
 0x137   :  { %2579 = vmatmul.mubr.bf16.gmra.mrb[4].mxu1 %v1332_v16  ;;  %2486 = vmatprep.subr.bf16.mxu0 %v2830_v53  ;;  %v2834_v16 = vld [vmem:[%s4046_s3 + $0xd0] sm:$0xff]   ;;  %v1681_v41 = vpop.permute.xlu1 %1680 }
 0x138   :  { %2587 = vmatpush3.bf16.msra.mxu1 %v2829_v28  ;;  %2598 = vmatprep.mubr.bf16.mxu1 %v4084_v17  ;;  %v1690_v37 = vmul.f32 %v1681_v41, %v3336_v7  ;;  %v2853_v7 = vld [vmem:[%s4048_s5 + $0x10] sm:$0xff]  }
 0x139   :  { %2479 = vmatmul.mubr.bf16.vlgmr.msra.gmra.mrb[8].mxu0 %v4086_v5  ;;  %2588 = vmatprep.subr.bf16.mxu1 %v2831_v42 }
 0x13a   :  { %2482 = vmatprep.mubr.bf16.mxu0 %v4087_v50  ;;  %2487 = vmatpush3.bf16.msra.mxu0 %v2830_v53 }
 0x13b   :  { %2488 = vmatprep.subr.bf16.mxu0 %v2832_v39 }
 0x13c   :  { %2589 = vmatpush3.bf16.msra.mxu1 %v2831_v42 }
 0x13d   :  { %2590 = vmatprep.subr.bf16.mxu1 %v2833_v27 }
 0x13e   :  { %2489 = vmatpush3.bf16.msra.mxu0 %v2832_v39 }
 0x13f   :  { %2490 = vmatprep.subr.bf16.mxu0 %v2834_v16 }
 0x140   :  { %2591 = vmatpush3.bf16.msra.mxu1 %v2833_v27 }
 0x141   :  { %2483 = vmatmul.mubr.bf16.gmra.mrb[12].mxu0 %v648_v31  ;;  %2592 = vmatprep.subr.bf16.mxu1 %v2835_v26  ;;  %v2841_v31 = vld [vmem:[%s4046_s3 + $0x200] sm:$0xff]  }
 0x142   :  { %2491 = vmatpush3.bf16.msra.mxu0 %v2834_v16  ;;  %2502 = vmatprep.mubr.bf16.mxu0 %v826_v15  ;;  %v4088_v15 = vld [vmem:[#allocation13_spill] sm:$0xff] }
 0x143   :  { %2492 = vmatprep.subr.bf16.mxu0 %v2836_v62  ;;  %v4090_v30 = vpack.c.bf16 %v4088_v15, %v4089_v21 }
 0x144   :  { %2593 = vmatpush3.bf16.msra.mxu1 %v2835_v26 }
 0x145   :  { %2594 = vmatprep.subr.bf16.mxu1 %v2837_v46 }
 0x146   :  { %2493 = vmatpush3.bf16.msra.mxu0 %v2836_v62 }
 0x147   :  { %2494 = vmatprep.subr.bf16.mxu0 %v2838_v33 }
 0x148   :  { %2595 = vmatpush3.bf16.msra.mxu1 %v2837_v46 }
 0x149   :  { %2596 = vmatprep.subr.bf16.mxu1 %v2839_v36 }
 0x14a   :  { %2495 = vmatpush3.bf16.msra.mxu0 %v2838_v33 }
 0x14b   :  { %2496 = vmatprep.subr.bf16.mxu0 %v2840_v60 }
 0x14c   :  { %2597 = vmatpush3.bf16.msra.mxu1 %v2839_v36 }
 0x14d   :  { %2606 = vmatprep.subr.bf16.mxu1 %v2841_v31 }
 0x14e   :  { %2497 = vmatpush3.bf16.msra.mxu0 %v2840_v60 }
 0x14f   :  { %2599 = vmatmul.mubr.bf16.vlgmr.msra.gmra.mrb[0].mxu1 %v4090_v30  ;;  %2498 = vmatprep.subr.bf16.mxu0 %v2842_v23 }
 0x150   :  { %2602 = vmatprep.mubr.bf16.mxu1 %v1512_v12  ;;  %2607 = vmatpush3.bf16.msra.mxu1 %v2841_v31  ;;  %v2849_v12 = vld [vmem:[%s4046_s3 + $0x230] sm:$0xff]  }
 0x151   :  { %2608 = vmatprep.subr.bf16.mxu1 %v2843_v18 }
 0x152   :  { %2499 = vmatpush3.bf16.msra.mxu0 %v2842_v23 }
 0x153   :  { %2500 = vmatprep.subr.bf16.mxu0 %v2844_v14 }
 0x154   :  { %2609 = vmatpush3.bf16.msra.mxu1 %v2843_v18 }
 0x155   :  { %2610 = vmatprep.subr.bf16.mxu1 %v2845_v58 }
 0x156   :  { %2501 = vmatpush3.bf16.msra.mxu0 %v2844_v14 }
 0x157   :  { %2603 = vmatmul.mubr.bf16.gmra.mrb[4].mxu1 %v1513_v9  ;;  %v1677_v9 = vpop.permute.xlu0 %1676  ;;  %2630 = vmatprep.subr.bf16.mxu0 %v2851_v8 }
 0x158   :  { %2611 = vmatpush3.bf16.msra.mxu1 %v2845_v58  ;;  %2622 = vmatprep.mubr.bf16.mxu1 %v1691_v25  ;;  %v1689_v56 = vmul.f32 %v1677_v9, %v3374_v45  ;;  %v2854_v45 = vld [vmem:[%s4048_s5 + $0x18] sm:$0xff]   ;;  %v2262_v58 = vld [vmem:[%s4049_s6] ss:$0 sm:$0xff] }
 0x159   :  { %2503 = vmatmul.mubr.bf16.vlgmr.msra.gmra.mrb[8].mxu0 %v827_v11  ;;  %2612 = vmatprep.subr.bf16.mxu1 %v2846_v44  ;;  %v2855_v11 = vld [vmem:[%s4048_s5 + $0x20] sm:$0xff]   ;;  %v1982_v9 = vld [vmem:[%s4051_s8 + $0x18] sm:$0xff] }
 0x15a   :  { %2506 = vmatprep.mubr.bf16.mxu0 %v828_v52  ;;  %v1694_v25 = vpack.c.bf16 %v1690_v37, %v1689_v56  ;;  %2631 = vmatpush3.bf16.msra.mxu0 %v2851_v8 }
 0x15b   :  { %2632 = vmatprep.subr.bf16.mxu0 %v2852_v59 }
 0x15c   :  { %2613 = vmatpush3.bf16.msra.mxu1 %v2846_v44 }
 0x15d   :  { %2614 = vmatprep.subr.bf16.mxu1 %v2847_v35 }
 0x15e   :  { %2633 = vmatpush3.bf16.msra.mxu0 %v2852_v59 }
 0x15f   :  { %2634 = vmatprep.subr.bf16.mxu0 %v2853_v7 }
 0x160   :  { %2615 = vmatpush3.bf16.msra.mxu1 %v2847_v35  ;;  %v1981_v35 = vld [vmem:[%s4051_s8 + $0x10] sm:$0xff] }
 0x161   :  { %2507 = vmatmul.mubr.bf16.gmra.mrb[12].mxu0 %v829_v13  ;;  %2616 = vmatprep.subr.bf16.mxu1 %v2848_v32 }
 0x162   :  { %2635 = vmatpush3.bf16.msra.mxu0 %v2853_v7  ;;  %v1980_v7 = vld [vmem:[%s4051_s8 + $0x8] sm:$0xff] }
 0x163   :  { %2636 = vmatprep.subr.bf16.mxu0 %v2854_v45 }
 0x164   :  { %2617 = vmatpush3.bf16.msra.mxu1 %v2848_v32 }
 0x165   :  { %2618 = vmatprep.subr.bf16.mxu1 %v2849_v12 }
 0x166   :  { %2637 = vmatpush3.bf16.msra.mxu0 %v2854_v45 }
 0x167   :  { %2638 = vmatprep.subr.bf16.mxu0 %v2855_v11 }
 0x168   :  { %2619 = vmatpush3.bf16.msra.mxu1 %v2849_v12 }
 0x169   :  { %2620 = vmatprep.subr.bf16.mxu1 %v2850_v38 }
 0x16a   :  { %2639 = vmatpush3.bf16.msra.mxu0 %v2855_v11 }
 0x16b   :  { %2640 = vmatprep.subr.bf16.mxu0 %v2856_v54 }
 0x16c   :  { %2621 = vmatpush3.bf16.msra.mxu1 %v2850_v38 }
 0x16e   :  { %2641 = vmatpush3.bf16.msra.mxu0 %v2856_v54  ;;  %v1997_v54 = vld [vmem:[%s4052_s9 + $0x10] sm:$0xff] }
 0x16f   :  { %2623 = vmatmul.mubr.bf16.vlgmr.msra.gmra.mrb[0].mxu1 %v1692_v4  ;;  %2642 = vmatprep.subr.bf16.mxu0 %v2857_v47  ;;  %v2858_v4 = vld [vmem:[%s4048_s5 + $0x38] sm:$0xff]  }
 0x170   :  { %2626 = vmatprep.mubr.bf16.mxu1 %v1693_v63 }
 0x172   :  { %2643 = vmatpush3.bf16.msra.mxu0 %v2857_v47  ;;  %v1998_v47 = vld [vmem:[%s4052_s9 + $0x18] sm:$0xff] }
 0x173   :  { %2644 = vmatprep.subr.bf16.mxu0 %v2858_v4 }
 0x176   :  { %2645 = vmatpush3.bf16.msra.mxu0 %v2858_v4 }
 0x177   :  { %2627 = vmatmul.mubr.bf16.gmra.mrb[4].mxu1 %v1694_v25  ;;  %v1979_v25 = vld [vmem:[%s4051_s8] sm:$0xff] }
 0x22c   :  { %v2504_v1 = vpop.f32.mrb[8].mxu0 }
 0x22d   :  { %v912_v24 = vpop.f32.mrb[9].mxu0 }
 0x22e   :  { %v2505_v3 = vpop.f32.mrb[10].mxu0 }
 0x22f   :  { %v915_v61 = vpop.f32.mrb[11].mxu0 }
 0x234   :  { %v2508_v52 = vpop.f32.mrb[12].mxu0 }
 0x235   :  { %v928_v29 = vpop.f32.mrb[13].mxu0 }
 0x236   :  { %v2509_v19 = vpop.f32.mrb[14].mxu0 }
 0x237   :  { %v931_v6 = vpop.f32.mrb[15].mxu0 }
 0x242   :  { %v2624_v40 = vpop.f32.mrb[0].mxu1 }
 0x243   :  { %v2654_v20 = vadd.f32 %v2624_v40, %v2504_v1  ;;  %v1777_v55 = vpop.f32.mrb[1].mxu1 }
 0x244   :  { %v2655_v57 = vadd.f32 %v1777_v55, %v912_v24  ;;  %v2625_v10 = vpop.f32.mrb[2].mxu1 }
 0x245   :  { %v1825_v63 = vadd.f32 %v2654_v20, %v2261_v0  ;;  %v2656_v28 = vadd.f32 %v2625_v10, %v2505_v3  ;;  %v1780_v34 = vpop.f32.mrb[3].mxu1  ;;  %v1996_v10 = vld [vmem:[%s4052_s9 + $0x8] sm:$0xff] }
 0x246   :  { %v1823_v43 = vadd.f32 %v2655_v57, %v2261_v0  ;;  %v2657_v2 = vadd.f32 %v1780_v34, %v915_v61  ;;  %v1985_v57 = vld [vmem:[%s4051_s8 + $0x30] sm:$0xff] }
 0x247   :  { %v1826_v22 = vadd.f32 %v2656_v28, %v2261_v0  ;;  %v1833_v13 = vmax.f32 %v1825_v63, 0.0 }
 0x248   :  { %v1824_v53 = vadd.f32 %v2657_v2, %v2261_v0  ;;  %v1831_v39 = vmax.f32 %v1823_v43, 0.0  ;;  %v1986_v2 = vld [vmem:[%s4051_s8 + $0x38] sm:$0xff] }
 0x249   :  { %v1834_v42 = vmax.f32 %v1826_v22, 0.0 }
 0x24a   :  { %v1832_v51 = vmax.f32 %v1824_v53, 0.0  ;;  %v2628_v48 = vpop.f32.mrb[4].mxu1 }
 0x24b   :  { %v1840_v17 = vpack.c.bf16 %v1834_v42, %v1833_v13  ;;  %v2658_v49 = vadd.f32 %v2628_v48, %v2508_v52  ;;  %v1793_v5 = vpop.f32.mrb[5].mxu1  ;;  %v1983_v42 = vld [vmem:[%s4051_s8 + $0x20] sm:$0xff]  ;;  %v1984_v48 = vld [vmem:[%s4051_s8 + $0x28] sm:$0xff] }
 0x24c   :  { %v2659_v27 = vadd.f32 %v1793_v5, %v928_v29  ;;  %v2629_v50 = vpop.f32.mrb[6].mxu1  ;;  %v1839_v16 = vpack.c.bf16 %v1832_v51, %v1831_v39 }
 0x24d   :  { %v1829_v26 = vadd.f32 %v2658_v49, %v2261_v0  ;;  %v2660_v62 = vadd.f32 %v2629_v50, %v2509_v19  ;;  %v1796_v46 = vpop.f32.mrb[7].mxu1  ;;  %v2002_v50 = vld [vmem:[%s4052_s9 + $0x38] sm:$0xff] }
 0x24e   :  { %v1827_v33 = vadd.f32 %v2659_v27, %v2261_v0  ;;  %v2661_v36 = vadd.f32 %v1796_v46, %v931_v6  ;;  %2646 = vmatprep.mubr.bf16.mxu0 %v1839_v16  ;;  %v2001_v27 = vld [vmem:[%s4052_s9 + $0x30] sm:$0xff] }
 0x24f   :  { %v1830_v60 = vadd.f32 %v2660_v62, %v2261_v0  ;;  %2647 = vmatmul.mubr.bf16.vlgmr.msra.gmra.mrb[16].mxu0 %v1840_v17  ;;  %v1837_v23 = vmax.f32 %v1829_v26, 0.0 }
 0x250   :  { %v1828_v31 = vadd.f32 %v2661_v36, %v2261_v0  ;;  %v1835_v15 = vmax.f32 %v1827_v33, 0.0  ;;  %v1995_v0 = vld [vmem:[%s4052_s9] sm:$0xff] }
 0x251   :  { %v1838_v18 = vmax.f32 %v1830_v60, 0.0 }
 0x252   :  { %v1836_v21 = vmax.f32 %v1828_v31, 0.0 }
 0x253   :  { %v1842_v30 = vpack.c.bf16 %v1838_v18, %v1837_v23 }
 0x254   :  { %v1841_v14 = vpack.c.bf16 %v1836_v21, %v1835_v15  ;;  %v2037_v15 = vld [vmem:[%s4053_s10 + $0x10] sm:$0xff] }
 0x256   :  { %2650 = vmatprep.mubr.bf16.mxu0 %v1841_v14  ;;  %v2000_v14 = vld [vmem:[%s4052_s9 + $0x28] sm:$0xff] }
 0x257   :  { %2651 = vmatmul.mubr.bf16.gmra.mrb[20].mxu0 %v1842_v30  ;;  %v1999_v30 = vld [vmem:[%s4052_s9 + $0x20] sm:$0xff] }
 0x322   :  { %v2648_v44 = vpop.f32.mrb[16].mxu0 }
 0x323   :  { %v3900_v32 = vadd.f32 %v2648_v44, %v2262_v58  ;;  %v1948_v12 = vpop.f32.mrb[17].mxu0 }
 0x324   :  { %v3902_v38 = vadd.f32 %v2262_v58, %v1948_v12  ;;  %v2649_v41 = vpop.f32.mrb[18].mxu0 }
 0x325   :  { %v1989_v37 = vmul.f32 %v1981_v35, %v3900_v32  ;;  %v2013_v56 = vmin.f32 %v3900_v32, 4.1351666  ;;  %v3912_v8 = vadd.f32 %v2649_v41, %v2262_v58  ;;  %v1951_v59 = vpop.f32.mrb[19].mxu0  ;;  %v2038_v35 = vld [vmem:[%s4053_s10 + $0x18] sm:$0xff] }
 0x326   :  { %v2011_v45 = vmin.f32 %v3902_v38, 4.1351666  ;;  %v3918_v11 = vadd.f32 %v2262_v58, %v1951_v59  ;;  %v1987_v3 = vmul.f32 %v1979_v25, %v3902_v38 }
 0x327   :  { %v2023_v4 = vmul.f32 1.442695, %v2013_v56  ;;  %v1990_v1 = vmul.f32 %v1982_v9, %v3912_v8  ;;  %v2014_v24 = vmin.f32 %v3912_v8, 4.1351666  ;;  %v3931_v6 = vadd.f32 %v1997_v54, %v1989_v37  ;;  %v2036_v9 = vld [vmem:[%s4053_s10 + $0x8] sm:$0xff] }
 0x328   :  { %v2019_v61 = vmul.f32 1.442695, %v2011_v45  ;;  %v1988_v52 = vmul.f32 %v1980_v7, %v3918_v11  ;;  %v2012_v29 = vmin.f32 %v3918_v11, 4.1351666  ;;  %v2003_v22 = vadd.f32 %v1995_v0, %v1987_v3 }
 0x329   :  { %2859 = vpow2.f32 %v2023_v4  ;;  %v2025_v19 = vmul.f32 1.442695, %v2014_v24  ;;  %v3933_v40 = vadd.f32 %v1998_v47, %v1990_v1  ;;  %2063 = vrot.lane.b32.xlu1 %v3931_v6, %s2907_s29  ;;  %v2041_v24 = vld [vmem:[%s4053_s10 + $0x30] sm:$0xff] }
 0x32a   :  { %2861 = vpow2.f32 %v2019_v61  ;;  %v2021_v20 = vmul.f32 1.442695, %v2012_v29  ;;  %v2652_v55 = vpop.f32.mrb[20].mxu0  ;;  %v2004_v17 = vadd.f32 %v1996_v10, %v1988_v52  ;;  %v2039_v61 = vld [vmem:[%s4053_s10 + $0x20] sm:$0xff]  ;;  %v2042_v29 = vld [vmem:[%s4053_s10 + $0x38] sm:$0xff] }
 0x32b   :  { %2863 = vpow2.f32 %v2025_v19  ;;  %v3946_v63 = vadd.f32 %v2652_v55, %v2262_v58  ;;  %2065 = vrot.lane.b32.xlu0 %v3933_v40, %s2907_s29  ;;  %v1964_v28 = vpop.f32.mrb[21].mxu0 }
 0x32c   :  { %2865 = vpow2.f32 %v2021_v20  ;;  %v3950_v34 = vadd.f32 %v2262_v58, %v1964_v28  ;;  %v2653_v43 = vpop.f32.mrb[22].mxu0 }
 0x32d   :  { %v1993_v53 = vmul.f32 %v1985_v57, %v3946_v63  ;;  %v2017_v13 = vmin.f32 %v3946_v63, 4.1351666  ;;  %v3960_v39 = vadd.f32 %v2653_v43, %v2262_v58  ;;  %v1967_v51 = vpop.f32.mrb[23].mxu0  ;;  %2059 = vrot.lane.b32.xlu1 %v2003_v22, %s2907_s29 }
 0x32e   :  { %v2015_v49 = vmin.f32 %v3950_v34, 4.1351666  ;;  %v3966_v5 = vadd.f32 %v2262_v58, %v1967_v51  ;;  %v1991_v46 = vmul.f32 %v1983_v42, %v3950_v34  ;;  %v2035_v58 = vld [vmem:[%s4053_s10] sm:$0xff] }
 0x32f   :  { %v2031_v16 = vmul.f32 1.442695, %v2017_v13  ;;  %v1994_v26 = vmul.f32 %v1986_v2, %v3960_v39  ;;  %v2018_v62 = vmin.f32 %v3960_v39, 4.1351666  ;;  %2061 = vrot.lane.b32.xlu0 %v2004_v17, %s2907_s29  ;;  %v2009_v23 = vadd.f32 %v2001_v27, %v1993_v53 }
 0x330   :  { %v2027_v33 = vmul.f32 1.442695, %v2015_v49  ;;  %v1992_v36 = vmul.f32 %v1984_v48, %v3966_v5  ;;  %v2016_v60 = vmin.f32 %v3966_v5, 4.1351666  ;;  %v2007_v56 = vadd.f32 %v1999_v30, %v1991_v46  ;;  %v2272_v46 = vld [vmem:[%s4055_s12] ss:$0 sm:$0xff] }
 0x331   :  { %2867 = vpow2.f32 %v2031_v16  ;;  %v2033_v31 = vmul.f32 1.442695, %v2018_v62  ;;  %v2010_v18 = vadd.f32 %v2002_v50, %v1994_v26  ;;  %2071 = vrot.lane.b32.xlu1 %v2009_v23, %s2907_s29  ;;  %v2140_v30 = vmul.f32 %v2272_v46, %v3912_v8 }
 0x332   :  { %2869 = vpow2.f32 %v2027_v33  ;;  %v2029_v21 = vmul.f32 1.442695, %v2016_v60  ;;  %v2008_v25 = vadd.f32 %v2000_v14, %v1992_v36  ;;  %v2271_v60 = vld [vmem:[%s4054_s11] ss:$0 sm:$0xff]  ;;  %s2909_s11 = smov [#allocation2]  }
 0x333   :  { %v2860_v44 = vpop.eup %2859  ;;  %2871 = vpow2.f32 %v2033_v31  ;;  %2073 = vrot.lane.b32.xlu0 %v2010_v18, %s2907_s29  ;;  %s2166_s12 = sshll.u32 %s2909_s11, 4  ;;  %s2167_s12 = int_to_ptr.vmem [resolvable:$true] %s2166_s12 }
 0x334   :  { %v2862_v12 = vpop.eup %2861  ;;  %2873 = vpow2.f32 %v2029_v21  ;;  %v2045_v41 = vmul.f32 %v2860_v44, %v2037_v15  ;;  %v2139_v21 = vmul.f32 %v2272_v46, %v3900_v32  ;;  %s2875_s2 = scalar_lea.vmem %s2167_s12, 1024  ;;  %p2880_p1 = scmp.lt.s32.totalorder %s2167_s12, %s2167_s12 }
 0x335   :  { %v2864_v37 = vpop.eup %2863  ;;  %v2043_v59 = vmul.f32 %v2862_v12, %v2035_v58  ;;  %2067 = vrot.lane.b32.xlu1 %v2007_v56, %s2907_s29  ;;  %p2876_p0 = scmp.ne.s32.totalorder %s2167_s12, %s2875_s2  ;;  %p2881_p2 = scmp.lt.s32.totalorder %s2875_s2, %s2875_s2 }
 0x336   :  { %v2866_v7 = vpop.eup %2865  ;;  %v2046_v45 = vmul.f32 %v2864_v37, %v2038_v35  ;;  %v2053_v54 = vadd.f32 %v2045_v41, %v3931_v6  ;;  %v2040_v6 = vld [vmem:[%s4053_s10 + $0x28] sm:$0xff] }
 0x337   :  { %2069 = vrot.lane.b32.xlu0 %v2008_v25, %s2907_s29  ;;  %v2044_v47 = vmul.f32 %v2866_v7, %v2036_v9  ;;  %v2051_v4 = vadd.f32 %v2043_v59, %v2003_v22  ;;  %p2882_p3 = por %p2881_p2, %p2880_p1 }
 0x338   :  { %v2054_v1 = vadd.f32 %v2046_v45, %v3933_v40 }
 0x339   :  { %v2052_v3 = vadd.f32 %v2044_v47, %v2004_v17  ;;  %2087 = vrot.lane.b32.xlu1 %v2045_v41, %s2908_s30  ;;  %p2883_p4 = pnand %p2882_p3, %p2876_p0 }
 0x33b   :  { %v2868_v52 = vpop.eup %2867  ;;  %2089 = vrot.lane.b32.xlu0 %v2046_v45, %s2908_s30  ;;  %v2137_v45 = vmul.f32 %v2272_v46, %v3902_v38  ;;  %v2142_v38 = vmul.f32 %v2272_v46, %v3966_v5 }
 0x33c   :  { %v2870_v19 = vpop.eup %2869  ;;  %v2049_v40 = vmul.f32 %v2868_v52, %v2041_v24 }
 0x33d   :  { %v2872_v0 = vpop.eup %2871  ;;  %v2047_v20 = vmul.f32 %v2870_v19, %v2039_v61  ;;  %2083 = vrot.lane.b32.xlu1 %v2043_v59, %s2908_s30 }
 0x33e   :  { %v2874_v55 = vpop.eup %2873  ;;  %v2050_v57 = vmul.f32 %v2872_v0, %v2042_v29  ;;  %v2057_v10 = vadd.f32 %v2049_v40, %v2009_v23 }
 0x33f   :  { %2085 = vrot.lane.b32.xlu0 %v2044_v47, %s2908_s30  ;;  %v2048_v28 = vmul.f32 %v2874_v55, %v2040_v6  ;;  %v2055_v43 = vadd.f32 %v2047_v20, %v2007_v56 }
 0x340   :  { %v2058_v2 = vadd.f32 %v2050_v57, %v2010_v18 }
 0x341   :  { %v2056_v22 = vadd.f32 %v2048_v28, %v2008_v25  ;;  %2091 = vrot.lane.b32.xlu1 %v2047_v20, %s2908_s30 }
 0x343   :  { %2093 = vrot.lane.b32.xlu0 %v2048_v28, %s2908_s30 }
 0x345   :  { %2095 = vrot.lane.b32.xlu1 %v2049_v40, %s2908_s30  ;;  %v2141_v40 = vmul.f32 %v2272_v46, %v3950_v34  ;;  %v2144_v34 = vmul.f32 %v2272_v46, %v3960_v39 }
 0x347   :  { %2097 = vrot.lane.b32.xlu0 %v2050_v57, %s2908_s30 }
 0x39b   :  { %v2064_v53 = vpop.permute.xlu1 %2063 }
 0x39c   :  { %v2077_v50 = vadd.f32 %v2064_v53, %v2053_v54  ;;  %v2138_v54 = vmul.f32 %v2272_v46, %v3918_v11  ;;  %v2143_v53 = vmul.f32 %v2272_v46, %v3946_v63 }
 0x39d   :  { %v2066_v13 = vpop.permute.xlu0 %2065 }
 0x39e   :  { %v2078_v16 = vadd.f32 %v2066_v13, %v2054_v1 }
 0x39f   :  { %v2060_v42 = vpop.permute.xlu1 %2059 }
 0x3a0   :  { %v2075_v31 = vadd.f32 %v2060_v42, %v2051_v4 }
 0x3a1   :  { %v2062_v51 = vpop.permute.xlu0 %2061 }
 0x3a2   :  { %v2076_v23 = vadd.f32 %v2062_v51, %v2052_v3 }
 0x3a3   :  { %v2072_v48 = vpop.permute.xlu1 %2071 }
 0x3a4   :  { %v2081_v3 = vadd.f32 %v2072_v48, %v2057_v10 }
 0x3a5   :  { %v2074_v17 = vpop.permute.xlu0 %2073 }
 0x3a6   :  { %v2082_v61 = vadd.f32 %v2074_v17, %v2058_v2 }
 0x3a7   :  { %v2068_v49 = vpop.permute.xlu1 %2067 }
 0x3a8   :  { %v2079_v9 = vadd.f32 %v2068_v49, %v2055_v43 }
 0x3a9   :  { %v2070_v27 = vpop.permute.xlu0 %2069 }
 0x3aa   :  { %v2080_v37 = vadd.f32 %v2070_v27, %v2056_v22 }
 0x3ab   :  { %v2088_v26 = vpop.permute.xlu1 %2087 }
 0x3ac   :  { %v2101_v33 = vsub.f32 %v2077_v50, %v2088_v26 }
 0x3ad   :  { %v2090_v62 = vpop.permute.xlu0 %2089 }
 0x3ae   :  { %v2102_v36 = vsub.f32 %v2078_v16, %v2090_v62  ;;  %v2110_v18 = vmax.f32 %v2101_v33, 0.0 }
 0x3af   :  { %v2084_v14 = vpop.permute.xlu1 %2083 }
 0x3b0   :  { %v2111_v15 = vmax.f32 %v2102_v36, 0.0  ;;  %v2124_v44 = vmin.f32 %v2271_v60, %v2110_v18  ;;  %v2099_v12 = vsub.f32 %v2075_v31, %v2084_v14 }
 0x3b1   :  { %v2086_v58 = vpop.permute.xlu0 %2085 }
 0x3b2   :  { %v2125_v35 = vmin.f32 %v2271_v60, %v2111_v15  ;;  %v2100_v41 = vsub.f32 %v2076_v23, %v2086_v58  ;;  %v2147_v56 = vadd.f32 %v2139_v21, %v2124_v44  ;;  %v2108_v59 = vmax.f32 %v2099_v12, 0.0 }
 0x3b3   :  { %v2092_v47 = vpop.permute.xlu1 %2091 }
 0x3b4   :  { %v2148_v25 = vadd.f32 %v2140_v30, %v2125_v35  ;;  %v2109_v7 = vmax.f32 %v2100_v41, 0.0  ;;  %2155 = vst [vmem:[#allocation2 + $0x10] sm:$0xff] %v2147_v56  ;;  %v2122_v8 = vmin.f32 %v2271_v60, %v2108_v59  ;;  %v2103_v1 = vsub.f32 %v2079_v9, %v2092_v47 }
 0x3b5   :  { %v2094_v32 = vpop.permute.xlu0 %2093 }
 0x3b6   :  { %2156 = vst [vmem:[#allocation2 + $0x18] sm:$0xff] %v2148_v25  ;;  %v2123_v4 = vmin.f32 %v2271_v60, %v2109_v7  ;;  %v2104_v24 = vsub.f32 %v2080_v37, %v2094_v32  ;;  %v2145_v52 = vadd.f32 %v2137_v45, %v2122_v8  ;;  %v2112_v19 = vmax.f32 %v2103_v1, 0.0 }
 0x3b7   :  { %v2096_v0 = vpop.permute.xlu1 %2095 }
 0x3b8   :  { %v2146_v29 = vadd.f32 %v2138_v54, %v2123_v4  ;;  %v2113_v6 = vmax.f32 %v2104_v24, 0.0  ;;  %2153 = vst [vmem:[#allocation2] sm:$0xff] %v2145_v52  ;;  %v2126_v20 = vmin.f32 %v2271_v60, %v2112_v19  ;;  %v2105_v57 = vsub.f32 %v2081_v3, %v2096_v0 }
 0x3b9   :  { %v2098_v11 = vpop.permute.xlu0 %2097 }
 0x3ba   :  { %2154 = vst [vmem:[#allocation2 + $0x8] sm:$0xff] %v2146_v29  ;;  %v2127_v55 = vmin.f32 %v2271_v60, %v2113_v6  ;;  %v2106_v28 = vsub.f32 %v2082_v61, %v2098_v11  ;;  %v2149_v43 = vadd.f32 %v2141_v40, %v2126_v20  ;;  %v2114_v10 = vmax.f32 %v2105_v57, 0.0 }
 0x3bc   :  { %v2150_v22 = vadd.f32 %v2142_v38, %v2127_v55  ;;  %v2115_v2 = vmax.f32 %v2106_v28, 0.0  ;;  %2157 = vst [vmem:[#allocation2 + $0x20] sm:$0xff] %v2149_v43  ;;  %v2128_v5 = vmin.f32 %v2271_v60, %v2114_v10 }
 0x3be   :  { %2158 = vst [vmem:[#allocation2 + $0x28] sm:$0xff] %v2150_v22  ;;  %v2129_v13 = vmin.f32 %v2271_v60, %v2115_v2  ;;  %v2151_v42 = vadd.f32 %v2143_v53, %v2128_v5 }
 0x3c0   :  { %v2152_v51 = vadd.f32 %v2144_v34, %v2129_v13  ;;  %2159 = vst [vmem:[#allocation2 + $0x30] sm:$0xff] %v2151_v42 }
 0x3c2   :  { %2160 = vst [vmem:[#allocation2 + $0x38] sm:$0xff] %v2152_v51 }
 0x3c3   :  { %2886 = shalt.err (!%p2883_p4)
}
 0x3c4   :  { %s2887_s8 = scalar_lea.hbm %s4056_s13, 1024 }
 0x3c5   :  { %p2888_p5 = scmp.ne.s32.totalorder %s4056_s13, %s2887_s8  ;;  %p2891_p6 = scmp.lt.u32.totalorder %s2887_s8, %s4056_s13 }
 0x3c7   :  { %p2893_p7 = pnand %p2891_p6, %p2888_p5 }
 0x3c9   :  { %2896 = shalt.err (!%p2893_p7)
}
 0x3ca   :  { %s2910_s20 = smov 128   ;;  %s2911_s21 = smov 8  }
 0x3cb   :  { %2172 = dma.vmem_to_hbm [thread:$0]  %s2167_s12, 1024, %s4056_s13, [#allocation3], %s2910_s20, %s2910_s20, %s2911_s21  }
 0x3cc   :  { %2897 = dma.done.wait [#allocation3], 1024  }
 0x3cd   :  { %2898 = vsyncadd [#allocation3], 4294966272 }
 0x3ce   :  { %2176 = vsyncpa [#allocation3], 1 }

</bundles_post_ra>
